<compile_context>
chip_gen: v7x
topology: tpu7x:2x2x1
jax: 0.10.0
libtpu: 0.0.40
codegen_flags: <defaults>
</compile_context>

<pallas_src>
import jax
import jax.numpy as jnp
from jax import lax
from jax.experimental import pallas as pl
from jax.experimental.pallas import tpu as pltpu

# ---- model hyper-parameters (small, forward math identical to the module) ----
B = 2              # batch
T = 16             # sequence length (<= block_size, causal mask over T)
C = 128            # n_embd (lane-dense: multiple of 128)
N_HEAD = 4
HS = C // N_HEAD   # head_size
HIDDEN = 4 * C     # ffwd hidden
BT = B * T         # folded row count
EPS = 1e-5         # nn.LayerNorm default eps
NEG_INF = -1e30    # additive causal / cross-batch mask value


def _layernorm(v, g, b):
    mu = jnp.mean(v, axis=-1, keepdims=True)
    var = jnp.mean((v - mu) ** 2, axis=-1, keepdims=True)
    return (v - mu) * lax.rsqrt(var + EPS) * g + b


def block_kernel(x_ref, mask_ref,
                 ln1_g_ref, ln1_b_ref,
                 wqkv_ref, wproj_ref, bproj_ref,
                 ln2_g_ref, ln2_b_ref,
                 w1_ref, b1_ref, w2_ref, b2_ref,
                 o_ref):
    x = x_ref[...]                                   # (B*T, C): batch folded into rows

    # ----- self-attention branch -----
    h1 = _layernorm(x, ln1_g_ref[...], ln1_b_ref[...])            # (BT, C)

    # All q/k/v heads in one leading-batch contraction:
    #   (3*N_HEAD, BT, C) @bmm (3*N_HEAD, C, HS) -> (3*N_HEAD, BT, HS)
    h1b = jnp.broadcast_to(h1, (3 * N_HEAD, BT, C))
    qkv = jnp.einsum("ntc,nch->nth", h1b, wqkv_ref[...],
                     preferred_element_type=jnp.float32)
    q3 = qkv[0:N_HEAD]                               # (N_HEAD, BT, HS)
    k3 = qkv[N_HEAD:2 * N_HEAD]
    v3 = qkv[2 * N_HEAD:3 * N_HEAD]

    scale = 1.0 / (HS ** 0.5)
    s = jnp.einsum("nqh,nkh->nqk", q3, k3,
                   preferred_element_type=jnp.float32) * scale    # (N_HEAD, BT, BT)
    # block-diagonal causal mask: 0 on same-batch causal pairs, -1e30 elsewhere.
    # Cross-batch probabilities underflow to exactly 0 after exp, so the
    # folded-batch attention equals the per-batch computation.
    s = s + mask_ref[...]
    s = s - jnp.max(s, axis=-1, keepdims=True)
    p = jnp.exp(s)
    p = p / jnp.sum(p, axis=-1, keepdims=True)       # softmax

    o3 = jnp.einsum("nqk,nkh->nqh", p, v3,
                    preferred_element_type=jnp.float32)           # (N_HEAD, BT, HS)

    # Fused output projection (no lane concat): sum_h (o_h @ Wproj_rows_h)
    proj = jnp.einsum("nqh,nhc->nqc", o3, wproj_ref[...],
                      preferred_element_type=jnp.float32)         # (N_HEAD, BT, C)
    sa = jnp.sum(proj, axis=0) + bproj_ref[...]
    x1 = x + sa                                      # residual 1

    # ----- feed-forward branch -----
    h2 = _layernorm(x1, ln2_g_ref[...], ln2_b_ref[...])
    ff = jnp.dot(h2, w1_ref[...], preferred_element_type=jnp.float32) + b1_ref[...]
    ff = jnp.maximum(ff, 0.0)                        # ReLU
    ff = jnp.dot(ff, w2_ref[...], preferred_element_type=jnp.float32) + b2_ref[...]

    o_ref[...] = x1 + ff                             # residual 2


def transformer_block(x, params):
    (ln1_g, ln1_b, wq, wk, wv, wproj, bproj,
     ln2_g, ln2_b, w1, b1, w2, b2) = params

    # Head-major weight stacks (host/XLA side, free).
    def per_head(w):                                 # (C, C) -> (N_HEAD, C, HS)
        return w.reshape(C, N_HEAD, HS).transpose(1, 0, 2)

    wqkv = jnp.concatenate([per_head(wq), per_head(wk), per_head(wv)],
                           axis=0)                   # (3*N_HEAD, C, HS)
    wproj3 = wproj.reshape(N_HEAD, HS, C)            # rows are concat-of-heads order

    # Block-diagonal causal additive mask over the folded (B*T) axis,
    # hoisted out of the kernel body.
    r = jnp.arange(BT)
    same_batch = (r[:, None] // T) == (r[None, :] // T)
    causal = r[:, None] >= r[None, :]
    mask = jnp.where(same_batch & causal, 0.0, NEG_INF).astype(jnp.float32)

    x2d = x.reshape(BT, C)

    full = lambda shape: pl.BlockSpec(shape, lambda i: (0,) * len(shape))

    out2d = pl.pallas_call(
        block_kernel,
        out_shape=jax.ShapeDtypeStruct((BT, C), jnp.float32),
        grid_spec=pltpu.PrefetchScalarGridSpec(
            num_scalar_prefetch=0,
            grid=(1,),                                            # single step: weights DMA'd once
            in_specs=[
                full((BT, C)),                                    # x (batch folded)
                full((BT, BT)),                                   # block-diag causal mask
                full((1, C)), full((1, C)),                       # ln1 gamma/beta
                full((3 * N_HEAD, C, HS)),                        # stacked q/k/v weights
                full((N_HEAD, HS, C)), full((1, C)),              # proj W (head-major), b
                full((1, C)), full((1, C)),                       # ln2 gamma/beta
                full((C, HIDDEN)), full((1, HIDDEN)),             # ffwd W1, b1
                full((HIDDEN, C)), full((1, C)),                  # ffwd W2, b2
            ],
            out_specs=full((BT, C)),
        ),
        compiler_params=pltpu.CompilerParams(
            dimension_semantics=("arbitrary",)),
    )(x2d, mask, ln1_g, ln1_b, wqkv, wproj3, bproj,
      ln2_g, ln2_b, w1, b1, w2, b2)

    return out2d.reshape(B, T, C)


# ---------- pure-JAX reference (same math, for validation) ----------
def reference_block(x, params):
    (ln1_g, ln1_b, wq, wk, wv, wproj, bproj,
     ln2_g, ln2_b, w1, b1, w2, b2) = params

    def ln(v, g, b):
        mu = jnp.mean(v, axis=-1, keepdims=True)
        var = jnp.mean((v - mu) ** 2, axis=-1, keepdims=True)
        return (v - mu) / jnp.sqrt(var + EPS) * g + b

    h1 = ln(x, ln1_g, ln1_b)
    q = h1 @ wq
    k = h1 @ wk
    v = h1 @ wv
    q = q.reshape(B, T, N_HEAD, HS).transpose(0, 2, 1, 3)
    k = k.reshape(B, T, N_HEAD, HS).transpose(0, 2, 1, 3)
    v = v.reshape(B, T, N_HEAD, HS).transpose(0, 2, 1, 3)
    s = jnp.einsum("bhqd,bhkd->bhqk", q, k) / (HS ** 0.5)
    mask = jnp.tril(jnp.ones((T, T), bool))
    s = jnp.where(mask, s, -jnp.inf)
    p = jax.nn.softmax(s, axis=-1)
    out = jnp.einsum("bhqk,bhkd->bhqd", p, v)
    out = out.transpose(0, 2, 1, 3).reshape(B, T, C)
    sa = out @ wproj + bproj
    x1 = x + sa
    h2 = ln(x1, ln2_g, ln2_b)
    ff = jnp.maximum(h2 @ w1 + b1, 0.0) @ w2 + b2
    return x1 + ff


def init_params(key):
    ks = jax.random.split(key, 8)
    scale = 0.02
    ln1_g = jnp.ones((1, C), jnp.float32)
    ln1_b = jnp.zeros((1, C), jnp.float32)
    wq = scale * jax.random.normal(ks[0], (C, C), jnp.float32)
    wk = scale * jax.random.normal(ks[1], (C, C), jnp.float32)
    wv = scale * jax.random.normal(ks[2], (C, C), jnp.float32)
    wproj = scale * jax.random.normal(ks[3], (C, C), jnp.float32)
    bproj = scale * jax.random.normal(ks[4], (1, C), jnp.float32)
    ln2_g = jnp.ones((1, C), jnp.float32)
    ln2_b = jnp.zeros((1, C), jnp.float32)
    w1 = scale * jax.random.normal(ks[5], (C, HIDDEN), jnp.float32)
    b1 = jnp.zeros((1, HIDDEN), jnp.float32)
    w2 = scale * jax.random.normal(ks[6], (HIDDEN, C), jnp.float32)
    b2 = jnp.zeros((1, C), jnp.float32)
    return (ln1_g, ln1_b, wq, wk, wv, wproj, bproj,
            ln2_g, ln2_b, w1, b1, w2, b2)


if __name__ == "__main__":
    key = jax.random.PRNGKey(0)
    kx, kp = jax.random.split(key)
    x = jax.random.normal(kx, (B, T, C), jnp.float32)
    params = init_params(kp)

    out = jax.block_until_ready(transformer_block(x, params))
    ref = jax.block_until_ready(reference_block(x, params))

    assert out.shape == (B, T, C)
    assert jnp.allclose(out, ref, atol=1e-3, rtol=1e-3), (
        f"max abs diff = {jnp.max(jnp.abs(out - ref))}")
    print("KERNEL_OK")
</pallas_src>

<mosaic_0001>
module attributes {stable_mosaic.version = 11 : i64} {
  func.func @block_kernel(%arg0: i32, %arg1: memref<32x128xf32, #tpu.memory_space<vmem>>, %arg2: memref<32x32xf32, #tpu.memory_space<vmem>>, %arg3: memref<1x128xf32, #tpu.memory_space<vmem>>, %arg4: memref<1x128xf32, #tpu.memory_space<vmem>>, %arg5: memref<12x128x32xf32, #tpu.memory_space<vmem>>, %arg6: memref<4x32x128xf32, #tpu.memory_space<vmem>>, %arg7: memref<1x128xf32, #tpu.memory_space<vmem>>, %arg8: memref<1x128xf32, #tpu.memory_space<vmem>>, %arg9: memref<1x128xf32, #tpu.memory_space<vmem>>, %arg10: memref<128x512xf32, #tpu.memory_space<vmem>>, %arg11: memref<1x512xf32, #tpu.memory_space<vmem>>, %arg12: memref<512x128xf32, #tpu.memory_space<vmem>>, %arg13: memref<1x128xf32, #tpu.memory_space<vmem>>, %arg14: memref<32x128xf32, #tpu.memory_space<vmem>>) attributes {dimension_semantics = [#tpu.dimension_semantics<arbitrary>], iteration_bounds = array<i64: 1>, scalar_prefetch = 0 : i64, scratch_operands = 0 : i64, tpu.core_type = #tpu.core_type<tc>, window_params = [{pipeline_mode = #tpu.pipeline_mode<synchronous>, transform_indices = @transform_0, window_bounds = array<i64: 32, 128>}, {pipeline_mode = #tpu.pipeline_mode<synchronous>, transform_indices = @transform_1, window_bounds = array<i64: 32, 32>}, {pipeline_mode = #tpu.pipeline_mode<synchronous>, transform_indices = @transform_2, window_bounds = array<i64: 1, 128>}, {pipeline_mode = #tpu.pipeline_mode<synchronous>, transform_indices = @transform_3, window_bounds = array<i64: 1, 128>}, {pipeline_mode = #tpu.pipeline_mode<synchronous>, transform_indices = @transform_4, window_bounds = array<i64: 12, 128, 32>}, {pipeline_mode = #tpu.pipeline_mode<synchronous>, transform_indices = @transform_5, window_bounds = array<i64: 4, 32, 128>}, {pipeline_mode = #tpu.pipeline_mode<synchronous>, transform_indices = @transform_6, window_bounds = array<i64: 1, 128>}, {pipeline_mode = #tpu.pipeline_mode<synchronous>, transform_indices = @transform_7, window_bounds = array<i64: 1, 128>}, {pipeline_mode = #tpu.pipeline_mode<synchronous>, transform_indices = @transform_8, window_bounds = array<i64: 1, 128>}, {pipeline_mode = #tpu.pipeline_mode<synchronous>, transform_indices = @transform_9, window_bounds = array<i64: 128, 512>}, {pipeline_mode = #tpu.pipeline_mode<synchronous>, transform_indices = @transform_10, window_bounds = array<i64: 1, 512>}, {pipeline_mode = #tpu.pipeline_mode<synchronous>, transform_indices = @transform_11, window_bounds = array<i64: 512, 128>}, {pipeline_mode = #tpu.pipeline_mode<synchronous>, transform_indices = @transform_12, window_bounds = array<i64: 1, 128>}, {pipeline_mode = #tpu.pipeline_mode<synchronous>, transform_indices = @transform_13, window_bounds = array<i64: 32, 128>}]} {
    %c0 = arith.constant 0 : index
    %c0_0 = arith.constant 0 : index
    %0 = vector.load %arg1[%c0, %c0_0] : memref<32x128xf32, #tpu.memory_space<vmem>>, vector<32x128xf32>
    %c0_1 = arith.constant 0 : index
    %c0_2 = arith.constant 0 : index
    %1 = vector.load %arg3[%c0_1, %c0_2] : memref<1x128xf32, #tpu.memory_space<vmem>>, vector<1x128xf32>
    %c0_3 = arith.constant 0 : index
    %c0_4 = arith.constant 0 : index
    %2 = vector.load %arg4[%c0_3, %c0_4] : memref<1x128xf32, #tpu.memory_space<vmem>>, vector<1x128xf32>
    %cst = arith.constant dense<0.000000e+00> : vector<32xf32>
    %3 = vector.multi_reduction <add>, %0, %cst [1] : vector<32x128xf32> to vector<32xf32>
    %4 = vector.shape_cast %3 : vector<32xf32> to vector<32x1xf32>
    %cst_5 = arith.constant 1.280000e+02 : f32
    %5 = vector.broadcast %cst_5 : f32 to vector<32x1xf32>
    %6 = arith.divf %4, %5 : vector<32x1xf32>
    %7 = vector.broadcast %6 : vector<32x1xf32> to vector<32x128xf32>
    %8 = arith.subf %0, %7 : vector<32x128xf32>
    %9 = arith.mulf %8, %8 : vector<32x128xf32>
    %cst_6 = arith.constant dense<0.000000e+00> : vector<32xf32>
    %10 = vector.multi_reduction <add>, %9, %cst_6 [1] : vector<32x128xf32> to vector<32xf32>
    %11 = vector.shape_cast %10 : vector<32xf32> to vector<32x1xf32>
    %cst_7 = arith.constant 1.280000e+02 : f32
    %12 = vector.broadcast %cst_7 : f32 to vector<32x1xf32>
    %13 = arith.divf %11, %12 : vector<32x1xf32>
    %14 = vector.broadcast %6 : vector<32x1xf32> to vector<32x128xf32>
    %15 = arith.subf %0, %14 : vector<32x128xf32>
    %cst_8 = arith.constant 9.99999974E-6 : f32
    %16 = vector.broadcast %cst_8 : f32 to vector<32x1xf32>
    %17 = arith.addf %13, %16 : vector<32x1xf32>
    %18 = math.rsqrt %17 : vector<32x1xf32>
    %19 = vector.broadcast %18 : vector<32x1xf32> to vector<32x128xf32>
    %20 = arith.mulf %15, %19 : vector<32x128xf32>
    %21 = vector.broadcast %1 : vector<1x128xf32> to vector<32x128xf32>
    %22 = arith.mulf %20, %21 : vector<32x128xf32>
    %23 = vector.broadcast %2 : vector<1x128xf32> to vector<32x128xf32>
    %24 = arith.addf %22, %23 : vector<32x128xf32>
    %25 = vector.shape_cast %24 : vector<32x128xf32> to vector<1x32x128xf32>
    %26 = vector.broadcast %25 : vector<1x32x128xf32> to vector<12x32x128xf32>
    %c0_9 = arith.constant 0 : index
    %c0_10 = arith.constant 0 : index
    %c0_11 = arith.constant 0 : index
    %27 = vector.load %arg5[%c0_9, %c0_10, %c0_11] : memref<12x128x32xf32, #tpu.memory_space<vmem>>, vector<12x128x32xf32>
    "tpu.trace_start"() <{level = 10 : i32, message = "ntc,nch->nth"}> : () -> ()
    %cst_12 = arith.constant dense<0.000000e+00> : vector<12x32x32xf32>
    %28 = tpu.matmul %26, %27, %cst_12 {dimension_numbers = #tpu.dot_dimension_numbers<[2], [1], [1], [2], [0, 0, 0, 1, 1, 2], [0], [0]>} : vector<12x32x128xf32>, vector<12x128x32xf32>, vector<12x32x32xf32> -> vector<12x32x32xf32>
    "tpu.trace_stop"() : () -> ()
    %29 = vector.extract_strided_slice %28 {offsets = [0, 0, 0], sizes = [4, 32, 32], strides = [1, 1, 1]} : vector<12x32x32xf32> to vector<4x32x32xf32>
    %30 = vector.extract_strided_slice %28 {offsets = [4, 0, 0], sizes = [4, 32, 32], strides = [1, 1, 1]} : vector<12x32x32xf32> to vector<4x32x32xf32>
    %31 = vector.extract_strided_slice %28 {offsets = [8, 0, 0], sizes = [4, 32, 32], strides = [1, 1, 1]} : vector<12x32x32xf32> to vector<4x32x32xf32>
    "tpu.trace_start"() <{level = 10 : i32, message = "nqh,nkh->nqk"}> : () -> ()
    %cst_13 = arith.constant dense<0.000000e+00> : vector<4x32x32xf32>
    %32 = tpu.matmul %29, %30, %cst_13 {dimension_numbers = #tpu.dot_dimension_numbers<[2], [2], [1], [1], [0, 0, 0, 1, 1, 1], [0], [0]>} : vector<4x32x32xf32>, vector<4x32x32xf32>, vector<4x32x32xf32> -> vector<4x32x32xf32>
    "tpu.trace_stop"() : () -> ()
    %cst_14 = arith.constant 0.176776692 : f32
    %33 = vector.broadcast %cst_14 : f32 to vector<4x32x32xf32>
    %34 = arith.mulf %32, %33 : vector<4x32x32xf32>
    %c0_15 = arith.constant 0 : index
    %c0_16 = arith.constant 0 : index
    %35 = vector.load %arg2[%c0_15, %c0_16] : memref<32x32xf32, #tpu.memory_space<vmem>>, vector<32x32xf32>
    %36 = vector.shape_cast %35 : vector<32x32xf32> to vector<1x32x32xf32>
    %37 = vector.broadcast %36 : vector<1x32x32xf32> to vector<4x32x32xf32>
    %38 = arith.addf %34, %37 : vector<4x32x32xf32>
    %cst_17 = arith.constant dense<0xFF800000> : vector<4x32xf32>
    %39 = vector.multi_reduction <maximumf>, %38, %cst_17 [2] : vector<4x32x32xf32> to vector<4x32xf32>
    %40 = vector.shape_cast %39 : vector<4x32xf32> to vector<4x32x1xf32>
    %41 = vector.broadcast %40 : vector<4x32x1xf32> to vector<4x32x32xf32>
    %42 = arith.subf %38, %41 : vector<4x32x32xf32>
    %43 = math.exp %42 : vector<4x32x32xf32>
    %cst_18 = arith.constant dense<0.000000e+00> : vector<4x32xf32>
    %44 = vector.multi_reduction <add>, %43, %cst_18 [2] : vector<4x32x32xf32> to vector<4x32xf32>
    %45 = vector.shape_cast %44 : vector<4x32xf32> to vector<4x32x1xf32>
    %46 = vector.broadcast %45 : vector<4x32x1xf32> to vector<4x32x32xf32>
    %47 = arith.divf %43, %46 : vector<4x32x32xf32>
    "tpu.trace_start"() <{level = 10 : i32, message = "nqk,nkh->nqh"}> : () -> ()
    %cst_19 = arith.constant dense<0.000000e+00> : vector<4x32x32xf32>
    %48 = tpu.matmul %47, %31, %cst_19 {dimension_numbers = #tpu.dot_dimension_numbers<[2], [1], [1], [2], [0, 0, 0, 1, 1, 2], [0], [0]>} : vector<4x32x32xf32>, vector<4x32x32xf32>, vector<4x32x32xf32> -> vector<4x32x32xf32>
    "tpu.trace_stop"() : () -> ()
    %c0_20 = arith.constant 0 : index
    %c0_21 = arith.constant 0 : index
    %c0_22 = arith.constant 0 : index
    %49 = vector.load %arg6[%c0_20, %c0_21, %c0_22] : memref<4x32x128xf32, #tpu.memory_space<vmem>>, vector<4x32x128xf32>
    "tpu.trace_start"() <{level = 10 : i32, message = "nqh,nhc->nqc"}> : () -> ()
    %cst_23 = arith.constant dense<0.000000e+00> : vector<4x32x128xf32>
    %50 = tpu.matmul %48, %49, %cst_23 {dimension_numbers = #tpu.dot_dimension_numbers<[2], [1], [1], [2], [0, 0, 0, 1, 1, 2], [0], [0]>} : vector<4x32x32xf32>, vector<4x32x128xf32>, vector<4x32x128xf32> -> vector<4x32x128xf32>
    "tpu.trace_stop"() : () -> ()
    %cst_24 = arith.constant dense<0.000000e+00> : vector<32x128xf32>
    %51 = vector.multi_reduction <add>, %50, %cst_24 [0] : vector<4x32x128xf32> to vector<32x128xf32>
    %c0_25 = arith.constant 0 : index
    %c0_26 = arith.constant 0 : index
    %52 = vector.load %arg7[%c0_25, %c0_26] : memref<1x128xf32, #tpu.memory_space<vmem>>, vector<1x128xf32>
    %53 = vector.broadcast %52 : vector<1x128xf32> to vector<32x128xf32>
    %54 = arith.addf %51, %53 : vector<32x128xf32>
    %55 = arith.addf %0, %54 : vector<32x128xf32>
    %c0_27 = arith.constant 0 : index
    %c0_28 = arith.constant 0 : index
    %56 = vector.load %arg8[%c0_27, %c0_28] : memref<1x128xf32, #tpu.memory_space<vmem>>, vector<1x128xf32>
    %c0_29 = arith.constant 0 : index
    %c0_30 = arith.constant 0 : index
    %57 = vector.load %arg9[%c0_29, %c0_30] : memref<1x128xf32, #tpu.memory_space<vmem>>, vector<1x128xf32>
    %cst_31 = arith.constant dense<0.000000e+00> : vector<32xf32>
    %58 = vector.multi_reduction <add>, %55, %cst_31 [1] : vector<32x128xf32> to vector<32xf32>
    %59 = vector.shape_cast %58 : vector<32xf32> to vector<32x1xf32>
    %cst_32 = arith.constant 1.280000e+02 : f32
    %60 = vector.broadcast %cst_32 : f32 to vector<32x1xf32>
    %61 = arith.divf %59, %60 : vector<32x1xf32>
    %62 = vector.broadcast %61 : vector<32x1xf32> to vector<32x128xf32>
    %63 = arith.subf %55, %62 : vector<32x128xf32>
    %64 = arith.mulf %63, %63 : vector<32x128xf32>
    %cst_33 = arith.constant dense<0.000000e+00> : vector<32xf32>
    %65 = vector.multi_reduction <add>, %64, %cst_33 [1] : vector<32x128xf32> to vector<32xf32>
    %66 = vector.shape_cast %65 : vector<32xf32> to vector<32x1xf32>
    %cst_34 = arith.constant 1.280000e+02 : f32
    %67 = vector.broadcast %cst_34 : f32 to vector<32x1xf32>
    %68 = arith.divf %66, %67 : vector<32x1xf32>
    %69 = vector.broadcast %61 : vector<32x1xf32> to vector<32x128xf32>
    %70 = arith.subf %55, %69 : vector<32x128xf32>
    %cst_35 = arith.constant 9.99999974E-6 : f32
    %71 = vector.broadcast %cst_35 : f32 to vector<32x1xf32>
    %72 = arith.addf %68, %71 : vector<32x1xf32>
    %73 = math.rsqrt %72 : vector<32x1xf32>
    %74 = vector.broadcast %73 : vector<32x1xf32> to vector<32x128xf32>
    %75 = arith.mulf %70, %74 : vector<32x128xf32>
    %76 = vector.broadcast %56 : vector<1x128xf32> to vector<32x128xf32>
    %77 = arith.mulf %75, %76 : vector<32x128xf32>
    %78 = vector.broadcast %57 : vector<1x128xf32> to vector<32x128xf32>
    %79 = arith.addf %77, %78 : vector<32x128xf32>
    %c0_36 = arith.constant 0 : index
    %c0_37 = arith.constant 0 : index
    %80 = vector.load %arg10[%c0_36, %c0_37] : memref<128x512xf32, #tpu.memory_space<vmem>>, vector<128x512xf32>
    %cst_38 = arith.constant dense<0.000000e+00> : vector<32x512xf32>
    %81 = tpu.matmul %79, %80, %cst_38 {dimension_numbers = #tpu.dot_dimension_numbers<[1], [0], [0], [1], [0, 0, 1, 1], [], []>} : vector<32x128xf32>, vector<128x512xf32>, vector<32x512xf32> -> vector<32x512xf32>
    %c0_39 = arith.constant 0 : index
    %c0_40 = arith.constant 0 : index
    %82 = vector.load %arg11[%c0_39, %c0_40] : memref<1x512xf32, #tpu.memory_space<vmem>>, vector<1x512xf32>
    %83 = vector.broadcast %82 : vector<1x512xf32> to vector<32x512xf32>
    %84 = arith.addf %81, %83 : vector<32x512xf32>
    %cst_41 = arith.constant 0.000000e+00 : f32
    %85 = vector.broadcast %cst_41 : f32 to vector<32x512xf32>
    %86 = arith.maximumf %84, %85 : vector<32x512xf32>
    %c0_42 = arith.constant 0 : index
    %c0_43 = arith.constant 0 : index
    %87 = vector.load %arg12[%c0_42, %c0_43] : memref<512x128xf32, #tpu.memory_space<vmem>>, vector<512x128xf32>
    %cst_44 = arith.constant dense<0.000000e+00> : vector<32x128xf32>
    %88 = tpu.matmul %86, %87, %cst_44 {dimension_numbers = #tpu.dot_dimension_numbers<[1], [0], [0], [1], [0, 0, 1, 1], [], []>} : vector<32x512xf32>, vector<512x128xf32>, vector<32x128xf32> -> vector<32x128xf32>
    %c0_45 = arith.constant 0 : index
    %c0_46 = arith.constant 0 : index
    %89 = vector.load %arg13[%c0_45, %c0_46] : memref<1x128xf32, #tpu.memory_space<vmem>>, vector<1x128xf32>
    %90 = vector.broadcast %89 : vector<1x128xf32> to vector<32x128xf32>
    %91 = arith.addf %88, %90 : vector<32x128xf32>
    %92 = arith.addf %55, %91 : vector<32x128xf32>
    %c0_47 = arith.constant 0 : index
    %c0_48 = arith.constant 0 : index
    %93 = vector.load %arg14[%c0_47, %c0_48] : memref<32x128xf32, #tpu.memory_space<vmem>>, vector<32x128xf32>
    tpu.vector_store %arg14[%c0_47, %c0_48], %92 {strides = array<i32>} : memref<32x128xf32, #tpu.memory_space<vmem>>, vector<32x128xf32>,
    return
  }
  func.func @transform_0(%arg0: i32) -> (i32, i32) {
    %c0_i32 = arith.constant 0 : i32
    %c0_i32_0 = arith.constant 0 : i32
    %c0_i32_1 = arith.constant 0 : i32
    return %c0_i32, %c0_i32_0 : i32, i32
  }
  func.func @transform_1(%arg0: i32) -> (i32, i32) {
    %c0_i32 = arith.constant 0 : i32
    %c0_i32_0 = arith.constant 0 : i32
    %c0_i32_1 = arith.constant 0 : i32
    return %c0_i32, %c0_i32_0 : i32, i32
  }
  func.func @transform_2(%arg0: i32) -> (i32, i32) {
    %c0_i32 = arith.constant 0 : i32
    %c0_i32_0 = arith.constant 0 : i32
    %c0_i32_1 = arith.constant 0 : i32
    return %c0_i32, %c0_i32_0 : i32, i32
  }
  func.func @transform_3(%arg0: i32) -> (i32, i32) {
    %c0_i32 = arith.constant 0 : i32
    %c0_i32_0 = arith.constant 0 : i32
    %c0_i32_1 = arith.constant 0 : i32
    return %c0_i32, %c0_i32_0 : i32, i32
  }
  func.func @transform_4(%arg0: i32) -> (i32, i32, i32) {
    %c0_i32 = arith.constant 0 : i32
    %c0_i32_0 = arith.constant 0 : i32
    %c0_i32_1 = arith.constant 0 : i32
    %c0_i32_2 = arith.constant 0 : i32
    return %c0_i32, %c0_i32_0, %c0_i32_1 : i32, i32, i32
  }
  func.func @transform_5(%arg0: i32) -> (i32, i32, i32) {
    %c0_i32 = arith.constant 0 : i32
    %c0_i32_0 = arith.constant 0 : i32
    %c0_i32_1 = arith.constant 0 : i32
    %c0_i32_2 = arith.constant 0 : i32
    return %c0_i32, %c0_i32_0, %c0_i32_1 : i32, i32, i32
  }
  func.func @transform_6(%arg0: i32) -> (i32, i32) {
    %c0_i32 = arith.constant 0 : i32
    %c0_i32_0 = arith.constant 0 : i32
    %c0_i32_1 = arith.constant 0 : i32
    return %c0_i32, %c0_i32_0 : i32, i32
  }
  func.func @transform_7(%arg0: i32) -> (i32, i32) {
    %c0_i32 = arith.constant 0 : i32
    %c0_i32_0 = arith.constant 0 : i32
    %c0_i32_1 = arith.constant 0 : i32
    return %c0_i32, %c0_i32_0 : i32, i32
  }
  func.func @transform_8(%arg0: i32) -> (i32, i32) {
    %c0_i32 = arith.constant 0 : i32
    %c0_i32_0 = arith.constant 0 : i32
    %c0_i32_1 = arith.constant 0 : i32
    return %c0_i32, %c0_i32_0 : i32, i32
  }
  func.func @transform_9(%arg0: i32) -> (i32, i32) {
    %c0_i32 = arith.constant 0 : i32
    %c0_i32_0 = arith.constant 0 : i32
    %c0_i32_1 = arith.constant 0 : i32
    return %c0_i32, %c0_i32_0 : i32, i32
  }
  func.func @transform_10(%arg0: i32) -> (i32, i32) {
    %c0_i32 = arith.constant 0 : i32
    %c0_i32_0 = arith.constant 0 : i32
    %c0_i32_1 = arith.constant 0 : i32
    return %c0_i32, %c0_i32_0 : i32, i32
  }
  func.func @transform_11(%arg0: i32) -> (i32, i32) {
    %c0_i32 = arith.constant 0 : i32
    %c0_i32_0 = arith.constant 0 : i32
    %c0_i32_1 = arith.constant 0 : i32
    return %c0_i32, %c0_i32_0 : i32, i32
  }
  func.func @transform_12(%arg0: i32) -> (i32, i32) {
    %c0_i32 = arith.constant 0 : i32
    %c0_i32_0 = arith.constant 0 : i32
    %c0_i32_1 = arith.constant 0 : i32
    return %c0_i32, %c0_i32_0 : i32, i32
  }
  func.func @transform_13(%arg0: i32) -> (i32, i32) {
    %c0_i32 = arith.constant 0 : i32
    %c0_i32_0 = arith.constant 0 : i32
    %c0_i32_1 = arith.constant 0 : i32
    return %c0_i32, %c0_i32_0 : i32, i32
  }
}

</mosaic_0001>

<bundles_post_ra>
// kernel: tpu_custom_call.1
= control target key start
LH: loop header
LB: loop body
LE: loop exit
PB: predicated region body
PF: predicated region fallthrough
CT: control target
= control target key end

     0   :  { %s6840_s0 = inlined_call_operand.vmem [shape: f32[32,128], index: 0, kind: input, shape index: {}]   ;;  %s6841_s1 = inlined_call_operand.vmem [shape: f32[32,32], index: 1, kind: input, shape index: {}]   ;;  %s6842_s2 = inlined_call_operand.vmem [shape: f32[1,128], index: 2, kind: input, shape index: {}]   ;;  %s6843_s3 = inlined_call_operand.vmem [shape: f32[1,128], index: 3, kind: input, shape index: {}]   ;;  %s6844_s4 = inlined_call_operand.vmem [shape: f32[12,128,32], index: 4, kind: input, shape index: {}]   ;;  %s6845_s5 = inlined_call_operand.vmem [shape: f32[4,32,128], index: 5, kind: input, shape index: {}]   ;;  %s6846_s6 = inlined_call_operand.vmem [shape: f32[1,128], index: 6, kind: input, shape index: {}]   ;;  %s6847_s7 = inlined_call_operand.vmem [shape: f32[1,128], index: 7, kind: input, shape index: {}]   ;;  %s6848_s8 = inlined_call_operand.vmem [shape: f32[1,128], index: 8, kind: input, shape index: {}]   ;;  %s6849_s9 = inlined_call_operand.vmem [shape: f32[128,512], index: 9, kind: input, shape index: {}]   ;;  %s6850_s10 = inlined_call_operand.vmem [shape: f32[1,512], index: 10, kind: input, shape index: {}]   ;;  %s6851_s11 = inlined_call_operand.vmem [shape: f32[512,128], index: 11, kind: input, shape index: {}]   ;;  %s6852_s12 = inlined_call_operand.vmem [shape: f32[1,128], index: 12, kind: input, shape index: {}]   ;;  %s6853_s13 = inlined_call_operand.hbm [shape: f32[32,128], index: 13, kind: output, shape index: {}]  }
   0x1   :  { %v45_v0 = vld [vmem:[%s6840_s0] sm:$0xff]  ;;  %v47_v1 = vld [vmem:[%s6840_s0 + $0x10] sm:$0xff] }
   0x2   :  { %51 = vadd.xlane.f32.xlu0 %v45_v0  ;;  %55 = vadd.xlane.f32.xlu1 %v47_v1 }
   0x3   :  { %18 = vsyncpa [#allocation3], 0  ;;  %v46_v2 = vld [vmem:[%s6840_s0 + $0x8] sm:$0xff]  ;;  %v48_v3 = vld [vmem:[%s6840_s0 + $0x18] sm:$0xff]  ;;  %vm1328_vm0 = vcmask 261120  }
   0x4   :  { %v116_v4 = vld [vmem:[%s6844_s4] sm:$0xff]  ;;  %v117_v5 = vld [vmem:[%s6844_s4 + $0x8] sm:$0xff]  ;;  %v118_v9 = vld [vmem:[%s6844_s4 + $0x10] sm:$0xff] }
   0x5   :  { %v132_v6 = vld [vmem:[%s6844_s4 + $0x80] sm:$0xff]  ;;  %v4525_v7 = vpack.c.bf16 %v117_v5, %v116_v4  ;;  %v133_v8 = vld [vmem:[%s6844_s4 + $0x88] sm:$0xff]  ;;  %v119_v10 = vld [vmem:[%s6844_s4 + $0x18] sm:$0xff] }
   0x6   :  { %53 = vadd.xlane.f32.xlu0 %v46_v2  ;;  %57 = vadd.xlane.f32.xlu1 %v48_v3  ;;  %v4557_v11 = vpack.c.bf16 %v133_v8, %v132_v6  ;;  %v4529_v12 = vpack.c.bf16 %v119_v10, %v118_v9  ;;  %v134_v13 = vld [vmem:[%s6844_s4 + $0x90] sm:$0xff]  ;;  %v135_v14 = vld [vmem:[%s6844_s4 + $0x98] sm:$0xff]  ;;  %v120_v32 = vld [vmem:[%s6844_s4 + $0x20] sm:$0xff] }
   0x7   :  { %4526 = vmatprep.subr.bf16.mxu0 %v4525_v7  ;;  %v4561_v15 = vpack.c.bf16 %v135_v14, %v134_v13  ;;  %v121_v33 = vld [vmem:[%s6844_s4 + $0x28] sm:$0xff]  ;;  %v136_v34 = vld [vmem:[%s6844_s4 + $0xa0] sm:$0xff]  ;;  %v122_v38 = vld [vmem:[%s6844_s4 + $0x30] sm:$0xff] }
   0x8   :  { %4558 = vmatprep.subr.bf16.mxu1 %v4557_v11  ;;  %4528 = vmatpush3.bf16.msra.mxu0 %v4525_v7  ;;  %v4533_v35 = vpack.c.bf16 %v121_v33, %v120_v32  ;;  %v137_v36 = vld [vmem:[%s6844_s4 + $0xa8] sm:$0xff]  ;;  %v123_v39 = vld [vmem:[%s6844_s4 + $0x38] sm:$0xff]  ;;  %v138_v40 = vld [vmem:[%s6844_s4 + $0xb0] sm:$0xff] }
   0x9   :  { %4560 = vmatpush3.bf16.msra.mxu1 %v4557_v11  ;;  %4530 = vmatprep.subr.bf16.mxu0 %v4529_v12  ;;  %v4565_v37 = vpack.c.bf16 %v137_v36, %v136_v34  ;;  %v4537_v41 = vpack.c.bf16 %v123_v39, %v122_v38  ;;  %v139_v42 = vld [vmem:[%s6844_s4 + $0xb8] sm:$0xff]  ;;  %v124_v44 = vld [vmem:[%s6844_s4 + $0x40] sm:$0xff]  ;;  %v125_v45 = vld [vmem:[%s6844_s4 + $0x48] sm:$0xff] }
   0xa   :  { %4562 = vmatprep.subr.bf16.mxu1 %v4561_v15  ;;  %v4569_v43 = vpack.c.bf16 %v139_v42, %v138_v40  ;;  %v140_v46 = vld [vmem:[%s6844_s4 + $0xc0] sm:$0xff]  ;;  %v4541_v47 = vpack.c.bf16 %v125_v45, %v124_v44  ;;  %v141_v48 = vld [vmem:[%s6844_s4 + $0xc8] sm:$0xff]  ;;  %v126_v50 = vld [vmem:[%s6844_s4 + $0x50] sm:$0xff] }
   0xb   :  { %v4573_v49 = vpack.c.bf16 %v141_v48, %v140_v46  ;;  %v127_v51 = vld [vmem:[%s6844_s4 + $0x58] sm:$0xff]  ;;  %v142_v52 = vld [vmem:[%s6844_s4 + $0xd0] sm:$0xff]  ;;  %v128_v56 = vld [vmem:[%s6844_s4 + $0x60] sm:$0xff] }
   0xc   :  { %4532 = vmatpush3.bf16.msra.mxu0 %v4529_v12  ;;  %v4545_v53 = vpack.c.bf16 %v127_v51, %v126_v50  ;;  %v143_v54 = vld [vmem:[%s6844_s4 + $0xd8] sm:$0xff]  ;;  %v129_v57 = vld [vmem:[%s6844_s4 + $0x68] sm:$0xff]  ;;  %v144_v58 = vld [vmem:[%s6844_s4 + $0xe0] sm:$0xff] }
   0xd   :  { %4564 = vmatpush3.bf16.msra.mxu1 %v4561_v15  ;;  %4534 = vmatprep.subr.bf16.mxu0 %v4533_v35  ;;  %v4577_v55 = vpack.c.bf16 %v143_v54, %v142_v52  ;;  %v4549_v59 = vpack.c.bf16 %v129_v57, %v128_v56  ;;  %v145_v60 = vld [vmem:[%s6844_s4 + $0xe8] sm:$0xff]  ;;  %v130_v62 = vld [vmem:[%s6844_s4 + $0x70] sm:$0xff]  ;;  %v131_v63 = vld [vmem:[%s6844_s4 + $0x78] sm:$0xff] }
   0xe   :  { %4566 = vmatprep.subr.bf16.mxu1 %v4565_v37  ;;  %v4581_v61 = vpack.c.bf16 %v145_v60, %v144_v58  ;;  %v148_v4 = vld [vmem:[%s6844_s4 + $0x100] sm:$0xff]  ;;  %v149_v5 = vld [vmem:[%s6844_s4 + $0x108] sm:$0xff]  ;;  %v150_v36 = vld [vmem:[%s6844_s4 + $0x110] sm:$0xff] }
   0xf   :  { %v164_v6 = vld [vmem:[%s6844_s4 + $0x180] sm:$0xff]  ;;  %v4589_v7 = vpack.c.bf16 %v149_v5, %v148_v4  ;;  %v165_v8 = vld [vmem:[%s6844_s4 + $0x188] sm:$0xff]  ;;  %v166_v38 = vld [vmem:[%s6844_s4 + $0x190] sm:$0xff] }
  0x10   :  { %4536 = vmatpush3.bf16.msra.mxu0 %v4533_v35  ;;  %v4621_v9 = vpack.c.bf16 %v165_v8, %v164_v6  ;;  %v152_v45 = vld [vmem:[%s6844_s4 + $0x120] sm:$0xff]  ;;  %v169_v48 = vld [vmem:[%s6844_s4 + $0x1a8] sm:$0xff]  ;;  %v154_v50 = vld [vmem:[%s6844_s4 + $0x130] sm:$0xff] }
  0x11   :  { %4568 = vmatpush3.bf16.msra.mxu1 %v4565_v37  ;;  %4538 = vmatprep.subr.bf16.mxu0 %v4537_v41  ;;  %v170_v54 = vld [vmem:[%s6844_s4 + $0x1b0] sm:$0xff]  ;;  %v156_v58 = vld [vmem:[%s6844_s4 + $0x140] sm:$0xff]  ;;  %vm6021_vm1 = vmpackc.low %vm1328_vm0, %vm1328_vm0 }
  0x12   :  { %4570 = vmatprep.subr.bf16.mxu1 %v4569_v43  ;;  %v172_v60 = vld [vmem:[%s6844_s4 + $0x1c0] sm:$0xff] }
  0x13   :  { %v160_v6 = vld [vmem:[%s6844_s4 + $0x160] sm:$0xff] }
  0x14   :  { %4540 = vmatpush3.bf16.msra.mxu0 %v4537_v41  ;;  %v176_v8 = vld [vmem:[%s6844_s4 + $0x1e0] sm:$0xff] }
  0x15   :  { %4572 = vmatpush3.bf16.msra.mxu1 %v4569_v43  ;;  %4542 = vmatprep.subr.bf16.mxu0 %v4541_v47 }
  0x16   :  { %4574 = vmatprep.subr.bf16.mxu1 %v4573_v49 }
  0x18   :  { %4544 = vmatpush3.bf16.msra.mxu0 %v4541_v47  ;;  %v153_v47 = vld [vmem:[%s6844_s4 + $0x128] sm:$0xff] }
  0x19   :  { %4576 = vmatpush3.bf16.msra.mxu1 %v4573_v49  ;;  %4546 = vmatprep.subr.bf16.mxu0 %v4545_v53  ;;  %v4597_v51 = vpack.c.bf16 %v153_v47, %v152_v45  ;;  %v189_v47 = vld [vmem:[%s6844_s4 + $0x248] sm:$0xff] }
  0x1a   :  { %4578 = vmatprep.subr.bf16.mxu1 %v4577_v55 }
  0x1c   :  { %4548 = vmatpush3.bf16.msra.mxu0 %v4545_v53  ;;  %v155_v53 = vld [vmem:[%s6844_s4 + $0x138] sm:$0xff] }
  0x1d   :  { %4580 = vmatpush3.bf16.msra.mxu1 %v4577_v55  ;;  %4550 = vmatprep.subr.bf16.mxu0 %v4549_v59  ;;  %v171_v55 = vld [vmem:[%s6844_s4 + $0x1b8] sm:$0xff]  ;;  %v4601_v56 = vpack.c.bf16 %v155_v53, %v154_v50 }
  0x1e   :  { %4582 = vmatprep.subr.bf16.mxu1 %v4581_v61  ;;  %v4633_v57 = vpack.c.bf16 %v171_v55, %v170_v54  ;;  %v191_v53 = vld [vmem:[%s6844_s4 + $0x258] sm:$0xff]  ;;  %v206_v54 = vld [vmem:[%s6844_s4 + $0x2d0] sm:$0xff] }
  0x1f   :  { %v207_v55 = vld [vmem:[%s6844_s4 + $0x2d8] sm:$0xff] }
  0x20   :  { %4552 = vmatpush3.bf16.msra.mxu0 %v4549_v59  ;;  %v157_v59 = vld [vmem:[%s6844_s4 + $0x148] sm:$0xff] }
  0x21   :  { %4584 = vmatpush3.bf16.msra.mxu1 %v4581_v61  ;;  %v173_v61 = vld [vmem:[%s6844_s4 + $0x1c8] sm:$0xff] }
  0x8f   :  { %v52_v16 = vpop.xlane.xlu0 %51  ;;  %v56_v17 = vpop.xlane.xlu1 %55 }
  0x90   :  { %v60_v18 = vmul.f32 0.0078125, %v52_v16  ;;  %v62_v19 = vmul.f32 0.0078125, %v56_v17 }
  0x92   :  { %v5383_v20 = vsub.f32 %v45_v0, %v60_v18  ;;  %v5385_v21 = vsub.f32 %v47_v1, %v62_v19  ;;  %v146_v0 = vld [vmem:[%s6844_s4 + $0xf0] sm:$0xff]  ;;  %v4553_v1 = vpack.c.bf16 %v131_v63, %v130_v62  ;;  %v4605_v62 = vpack.c.bf16 %v157_v59, %v156_v58  ;;  %v192_v58 = vld [vmem:[%s6844_s4 + $0x260] sm:$0xff]  ;;  %v193_v59 = vld [vmem:[%s6844_s4 + $0x268] sm:$0xff] }
  0x93   :  { %v54_v22 = vpop.xlane.xlu0 %53  ;;  %v58_v23 = vpop.xlane.xlu1 %57  ;;  %v4637_v63 = vpack.c.bf16 %v173_v61, %v172_v60  ;;  %v208_v60 = vld [vmem:[%s6844_s4 + $0x2e0] sm:$0xff]  ;;  %v209_v61 = vld [vmem:[%s6844_s4 + $0x2e8] sm:$0xff] }
  0x94   :  { %v61_v24 = vmul.f32 0.0078125, %v54_v22  ;;  %v68_v25 = vmul.f32 %v5383_v20, %v5383_v20  ;;  %v63_v26 = vmul.f32 0.0078125, %v58_v23  ;;  %v70_v29 = vmul.f32 %v5385_v21, %v5385_v21  ;;  %4554 = vmatprep.subr.bf16.mxu0 %v4553_v1 }
  0x95   :  { %4556 = vmatpush3.bf16.msra.mxu0 %v4553_v1  ;;  %v159_v1 = vld [vmem:[%s6844_s4 + $0x158] sm:$0xff] }
  0x96   :  { %v5389_v27 = vsub.f32 %v46_v2, %v61_v24  ;;  %72 = vadd.xlane.f32.xlu0 %v68_v25  ;;  %v5391_v28 = vsub.f32 %v48_v3, %v63_v26  ;;  %v147_v2 = vld [vmem:[%s6844_s4 + $0xf8] sm:$0xff]  ;;  %4590 = vmatprep.subr.bf16.mxu0 %v4589_v7  ;;  %v3407_v25 = vld [vmem:[%s6842_s2] ss:$0 sm:$0xff] }
  0x97   :  { %v4585_v3 = vpack.c.bf16 %v147_v2, %v146_v0  ;;  %v158_v0 = vld [vmem:[%s6844_s4 + $0x150] sm:$0xff] }
  0x98   :  { %v69_v30 = vmul.f32 %v5389_v27, %v5389_v27  ;;  %v71_v31 = vmul.f32 %v5391_v28, %v5391_v28  ;;  %v174_v2 = vld [vmem:[%s6844_s4 + $0x1d0] sm:$0xff]  ;;  %v4609_v4 = vpack.c.bf16 %v159_v1, %v158_v0  ;;  %v195_v1 = vld [vmem:[%s6844_s4 + $0x278] sm:$0xff] }
  0x99   :  { %4586 = vmatprep.subr.bf16.mxu1 %v4585_v3  ;;  %v194_v0 = vld [vmem:[%s6844_s4 + $0x270] sm:$0xff] }
  0x9a   :  { %76 = vadd.xlane.f32.xlu0 %v70_v29  ;;  %74 = vadd.xlane.f32.xlu1 %v69_v30  ;;  %v3408_v29 = vld [vmem:[%s6843_s3] ss:$0 sm:$0xff] }
  0x9b   :  { %4588 = vmatpush3.bf16.msra.mxu1 %v4585_v3  ;;  %v175_v3 = vld [vmem:[%s6844_s4 + $0x1d8] sm:$0xff] }
  0x9c   :  { %4622 = vmatprep.subr.bf16.mxu1 %v4621_v9  ;;  %v4641_v5 = vpack.c.bf16 %v175_v3, %v174_v2  ;;  %v210_v2 = vld [vmem:[%s6844_s4 + $0x2f0] sm:$0xff]  ;;  %v211_v3 = vld [vmem:[%s6844_s4 + $0x2f8] sm:$0xff] }
  0x9e   :  { %78 = vadd.xlane.f32.xlu1 %v71_v31 }
 0x123   :  { %v73_v10 = vpop.xlane.xlu0 %72 }
 0x124   :  { %v80_v11 = vmul.f32 0.0078125, %v73_v10 }
 0x126   :  { %v84_v12 = vadd.f32 1e-05, %v80_v11 }
 0x127   :  { %v75_v13 = vpop.xlane.xlu1 %74  ;;  %v77_v14 = vpop.xlane.xlu0 %76 }
 0x128   :  { %5165 = vrsqrt.f32 %v84_v12  ;;  %v81_v15 = vmul.f32 0.0078125, %v75_v13  ;;  %v82_v16 = vmul.f32 0.0078125, %v77_v14  ;;  %v162_v12 = vld [vmem:[%s6844_s4 + $0x170] sm:$0xff]  ;;  %v163_v13 = vld [vmem:[%s6844_s4 + $0x178] sm:$0xff] }
 0x129   :  { %v178_v14 = vld [vmem:[%s6844_s4 + $0x1f0] sm:$0xff] }
 0x12a   :  { %v85_v17 = vadd.f32 1e-05, %v81_v15  ;;  %v86_v18 = vadd.f32 1e-05, %v82_v16  ;;  %v179_v15 = vld [vmem:[%s6844_s4 + $0x1f8] sm:$0xff]  ;;  %v4617_v16 = vpack.c.bf16 %v163_v13, %v162_v12  ;;  %v214_v12 = vld [vmem:[%s6844_s4 + $0x310] sm:$0xff] }
 0x12b   :  { %v79_v19 = vpop.xlane.xlu1 %78  ;;  %v215_v13 = vld [vmem:[%s6844_s4 + $0x318] sm:$0xff] }
 0x12c   :  { %5167 = vrsqrt.f32 %v85_v17  ;;  %v83_v22 = vmul.f32 0.0078125, %v79_v19  ;;  %v4649_v17 = vpack.c.bf16 %v179_v15, %v178_v14  ;;  %v181_v19 = vld [vmem:[%s6844_s4 + $0x208] sm:$0xff]  ;;  %v230_v14 = vld [vmem:[%s6844_s4 + $0x390] sm:$0xff]  ;;  %v231_v15 = vld [vmem:[%s6844_s4 + $0x398] sm:$0xff] }
 0x12d   :  { %5169 = vrsqrt.f32 %v86_v18  ;;  %v180_v18 = vld [vmem:[%s6844_s4 + $0x200] sm:$0xff] }
 0x12e   :  { %v87_v23 = vadd.f32 1e-05, %v83_v22  ;;  %v196_v22 = vld [vmem:[%s6844_s4 + $0x280] sm:$0xff] }
 0x130   :  { %5171 = vrsqrt.f32 %v87_v23  ;;  %v197_v23 = vld [vmem:[%s6844_s4 + $0x288] sm:$0xff] }
 0x132   :  { %v5166_v24 = vpop.eup %5165 }
 0x133   :  { %v92_v26 = vmul.f32 %v5166_v24, %v5383_v20  ;;  %v151_v20 = vld [vmem:[%s6844_s4 + $0x118] sm:$0xff]  ;;  %v4653_v24 = vpack.c.bf16 %v181_v19, %v180_v18  ;;  %v216_v18 = vld [vmem:[%s6844_s4 + $0x320] sm:$0xff]  ;;  %v217_v19 = vld [vmem:[%s6844_s4 + $0x328] sm:$0xff] }
 0x134   :  { %v4593_v43 = vpack.c.bf16 %v151_v20, %v150_v36  ;;  %v185_v36 = vld [vmem:[%s6844_s4 + $0x228] sm:$0xff] }
 0x135   :  { %v102_v30 = vmul.f32 %v3407_v25, %v92_v26  ;;  %v182_v26 = vld [vmem:[%s6844_s4 + $0x210] sm:$0xff]  ;;  %v201_v20 = vld [vmem:[%s6844_s4 + $0x2a8] sm:$0xff] }
 0x136   :  { %v5168_v31 = vpop.eup %5167 }
 0x137   :  { %v5170_v32 = vpop.eup %5169  ;;  %v5490_v33 = vadd.f32 %v3408_v29, %v102_v30  ;;  %v93_v34 = vmul.f32 %v5168_v31, %v5389_v27  ;;  %v198_v30 = vld [vmem:[%s6844_s4 + $0x290] sm:$0xff]  ;;  %v199_v31 = vld [vmem:[%s6844_s4 + $0x298] sm:$0xff] }
 0x138   :  { %v94_v35 = vmul.f32 %v5170_v32, %v5385_v21  ;;  %v167_v21 = vld [vmem:[%s6844_s4 + $0x198] sm:$0xff] }
 0x139   :  { %v103_v37 = vmul.f32 %v3407_v25, %v93_v34  ;;  %3933 = vmatprep.mubr.f32.mxu0 %v5490_v33  ;;  %3971 = vmatprep.mubr.f32.mxu1 %v5490_v33  ;;  %v4625_v44 = vpack.c.bf16 %v167_v21, %v166_v38  ;;  %v4689_v34 = vpack.c.bf16 %v199_v31, %v198_v30  ;;  %v234_v30 = vld [vmem:[%s6844_s4 + $0x3b0] sm:$0xff]  ;;  %v235_v31 = vld [vmem:[%s6844_s4 + $0x3b8] sm:$0xff] }
 0x13a   :  { %v5172_v27 = vpop.eup %5171  ;;  %v104_v39 = vmul.f32 %v3407_v25, %v94_v35  ;;  %v184_v35 = vld [vmem:[%s6844_s4 + $0x220] sm:$0xff] }
 0x13b   :  { %v5508_v40 = vadd.f32 %v3408_v29, %v103_v37  ;;  %v95_v41 = vmul.f32 %v5172_v27, %v5391_v28  ;;  %v168_v28 = vld [vmem:[%s6844_s4 + $0x1a0] sm:$0xff]  ;;  %v4661_v38 = vpack.c.bf16 %v185_v36, %v184_v35  ;;  %v186_v27 = vld [vmem:[%s6844_s4 + $0x230] sm:$0xff]  ;;  %v221_v36 = vld [vmem:[%s6844_s4 + $0x348] sm:$0xff] }
 0x13c   :  { %v5511_v42 = vadd.f32 %v3408_v29, %v104_v39  ;;  %v4629_v52 = vpack.c.bf16 %v169_v48, %v168_v28  ;;  %v200_v37 = vld [vmem:[%s6844_s4 + $0x2a0] sm:$0xff]  ;;  %v187_v39 = vld [vmem:[%s6844_s4 + $0x238] sm:$0xff]  ;;  %v205_v48 = vld [vmem:[%s6844_s4 + $0x2c8] sm:$0xff] }
 0x13d   :  { %v105_v46 = vmul.f32 %v3407_v25, %v95_v41  ;;  %3934 = vmatmul.mubr.f32.vlgmr.msra.gmra.mrb[0].mxu0 %v5508_v40  ;;  %3972 = vmatmul.mubr.f32.vlgmr.msra.gmra.mrb[0].mxu1 %v5508_v40  ;;  %v4685_v25 = vpack.c.bf16 %v197_v23, %v196_v22  ;;  %v4693_v21 = vpack.c.bf16 %v201_v20, %v200_v37  ;;  %v202_v41 = vld [vmem:[%s6844_s4 + $0x2b0] sm:$0xff]  ;;  %v204_v28 = vld [vmem:[%s6844_s4 + $0x2c0] sm:$0xff]  ;;  %v233_v23 = vld [vmem:[%s6844_s4 + $0x3a8] sm:$0xff] }
 0x13e   :  { %4592 = vmatpush3.bf16.msra.mxu0 %v4589_v7  ;;  %4624 = vmatpush3.bf16.msra.mxu1 %v4621_v9  ;;  %v161_v7 = vld [vmem:[%s6844_s4 + $0x168] sm:$0xff]  ;;  %v232_v22 = vld [vmem:[%s6844_s4 + $0x3a0] sm:$0xff] }
 0x13f   :  { %v5527_v49 = vadd.f32 %v3408_v29, %v105_v46  ;;  %3936 = vmatprep.mubr.f32.mxu0 %v5511_v42  ;;  %3974 = vmatprep.mubr.f32.mxu1 %v5511_v42  ;;  %v177_v9 = vld [vmem:[%s6844_s4 + $0x1e8] sm:$0xff]  ;;  %v4613_v10 = vpack.c.bf16 %v161_v7, %v160_v6  ;;  %v183_v29 = vld [vmem:[%s6844_s4 + $0x218] sm:$0xff]  ;;  %v188_v46 = vld [vmem:[%s6844_s4 + $0x240] sm:$0xff] }
 0x140   :  { %4594 = vmatprep.subr.bf16.mxu0 %v4593_v43  ;;  %4626 = vmatprep.subr.bf16.mxu1 %v4625_v44  ;;  %v4645_v11 = vpack.c.bf16 %v177_v9, %v176_v8  ;;  %v4657_v32 = vpack.c.bf16 %v183_v29, %v182_v26  ;;  %v4669_v50 = vpack.c.bf16 %v189_v47, %v188_v46  ;;  %v212_v6 = vld [vmem:[%s6844_s4 + $0x300] sm:$0xff]  ;;  %v213_v7 = vld [vmem:[%s6844_s4 + $0x308] sm:$0xff]  ;;  %v218_v26 = vld [vmem:[%s6844_s4 + $0x330] sm:$0xff] }
 0x141   :  { %3937 = vmatmul.mubr.f32.gmra.mrb[2].mxu0 %v5527_v49  ;;  %3975 = vmatmul.mubr.f32.gmra.mrb[2].mxu1 %v5527_v49  ;;  %v228_v8 = vld [vmem:[%s6844_s4 + $0x380] sm:$0xff]  ;;  %v229_v9 = vld [vmem:[%s6844_s4 + $0x388] sm:$0xff]  ;;  %v219_v29 = vld [vmem:[%s6844_s4 + $0x338] sm:$0xff] }
 0x142   :  { %4596 = vmatpush3.bf16.msra.mxu0 %v4593_v43  ;;  %4628 = vmatpush3.bf16.msra.mxu1 %v4625_v44  ;;  %v203_v43 = vld [vmem:[%s6844_s4 + $0x2b8] sm:$0xff]  ;;  %v4665_v44 = vpack.c.bf16 %v187_v39, %v186_v27  ;;  %v220_v35 = vld [vmem:[%s6844_s4 + $0x340] sm:$0xff]  ;;  %v237_v20 = vld [vmem:[%s6844_s4 + $0x3c8] sm:$0xff] }
 0x143   :  { %4009 = vmatprep.mubr.f32.mxu0 %v5490_v33  ;;  %4047 = vmatprep.mubr.f32.mxu1 %v5490_v33  ;;  %v4697_v45 = vpack.c.bf16 %v203_v43, %v202_v41  ;;  %v236_v37 = vld [vmem:[%s6844_s4 + $0x3c0] sm:$0xff]  ;;  %v222_v27 = vld [vmem:[%s6844_s4 + $0x350] sm:$0xff]  ;;  %v223_v39 = vld [vmem:[%s6844_s4 + $0x358] sm:$0xff] }
 0x144   :  { %4598 = vmatprep.subr.bf16.mxu0 %v4597_v51  ;;  %4630 = vmatprep.subr.bf16.mxu1 %v4629_v52  ;;  %v238_v41 = vld [vmem:[%s6844_s4 + $0x3d0] sm:$0xff]  ;;  %v239_v43 = vld [vmem:[%s6844_s4 + $0x3d8] sm:$0xff]  ;;  %v224_v46 = vld [vmem:[%s6844_s4 + $0x360] sm:$0xff] }
 0x145   :  { %v225_v47 = vld [vmem:[%s6844_s4 + $0x368] sm:$0xff] }
 0x146   :  { %4600 = vmatpush3.bf16.msra.mxu0 %v4597_v51  ;;  %4632 = vmatpush3.bf16.msra.mxu1 %v4629_v52  ;;  %v4701_v51 = vpack.c.bf16 %v205_v48, %v204_v28  ;;  %v190_v52 = vld [vmem:[%s6844_s4 + $0x250] sm:$0xff]  ;;  %v240_v28 = vld [vmem:[%s6844_s4 + $0x3e0] sm:$0xff]  ;;  %v241_v48 = vld [vmem:[%s6844_s4 + $0x3e8] sm:$0xff] }
 0x147   :  { %4602 = vmatprep.subr.bf16.mxu0 %v4601_v56  ;;  %4634 = vmatprep.subr.bf16.mxu1 %v4633_v57 }
 0x14a   :  { %4604 = vmatpush3.bf16.msra.mxu0 %v4601_v56  ;;  %4636 = vmatpush3.bf16.msra.mxu1 %v4633_v57  ;;  %v4673_v56 = vpack.c.bf16 %v191_v53, %v190_v52  ;;  %v4705_v57 = vpack.c.bf16 %v207_v55, %v206_v54  ;;  %v226_v52 = vld [vmem:[%s6844_s4 + $0x370] sm:$0xff]  ;;  %v227_v53 = vld [vmem:[%s6844_s4 + $0x378] sm:$0xff] }
 0x14b   :  { %4606 = vmatprep.subr.bf16.mxu0 %v4605_v62  ;;  %4638 = vmatprep.subr.bf16.mxu1 %v4637_v63  ;;  %v242_v54 = vld [vmem:[%s6844_s4 + $0x3f0] sm:$0xff]  ;;  %v243_v55 = vld [vmem:[%s6844_s4 + $0x3f8] sm:$0xff] }
 0x14e   :  { %4608 = vmatpush3.bf16.msra.mxu0 %v4605_v62  ;;  %4640 = vmatpush3.bf16.msra.mxu1 %v4637_v63  ;;  %v4677_v62 = vpack.c.bf16 %v193_v59, %v192_v58  ;;  %v4709_v63 = vpack.c.bf16 %v209_v61, %v208_v60  ;;  %v244_v58 = vld [vmem:[%s6844_s4 + $0x400] sm:$0xff]  ;;  %v245_v59 = vld [vmem:[%s6844_s4 + $0x408] sm:$0xff] }
 0x14f   :  { %4610 = vmatprep.subr.bf16.mxu0 %v4609_v4  ;;  %4642 = vmatprep.subr.bf16.mxu1 %v4641_v5  ;;  %v260_v60 = vld [vmem:[%s6844_s4 + $0x480] sm:$0xff]  ;;  %v261_v61 = vld [vmem:[%s6844_s4 + $0x488] sm:$0xff] }
 0x152   :  { %4612 = vmatpush3.bf16.msra.mxu0 %v4609_v4  ;;  %4644 = vmatpush3.bf16.msra.mxu1 %v4641_v5  ;;  %v4681_v4 = vpack.c.bf16 %v195_v1, %v194_v0  ;;  %v4713_v5 = vpack.c.bf16 %v211_v3, %v210_v2  ;;  %v246_v0 = vld [vmem:[%s6844_s4 + $0x410] sm:$0xff]  ;;  %v247_v1 = vld [vmem:[%s6844_s4 + $0x418] sm:$0xff] }
 0x153   :  { %4614 = vmatprep.subr.bf16.mxu0 %v4613_v10  ;;  %4646 = vmatprep.subr.bf16.mxu1 %v4645_v11  ;;  %v262_v2 = vld [vmem:[%s6844_s4 + $0x490] sm:$0xff]  ;;  %v263_v3 = vld [vmem:[%s6844_s4 + $0x498] sm:$0xff] }
 0x156   :  { %4616 = vmatpush3.bf16.msra.mxu0 %v4613_v10  ;;  %4648 = vmatpush3.bf16.msra.mxu1 %v4645_v11  ;;  %v4717_v10 = vpack.c.bf16 %v213_v7, %v212_v6  ;;  %v4749_v11 = vpack.c.bf16 %v229_v9, %v228_v8  ;;  %v248_v6 = vld [vmem:[%s6844_s4 + $0x420] sm:$0xff]  ;;  %v249_v7 = vld [vmem:[%s6844_s4 + $0x428] sm:$0xff] }
 0x157   :  { %4618 = vmatprep.subr.bf16.mxu0 %v4617_v16  ;;  %4650 = vmatprep.subr.bf16.mxu1 %v4649_v17  ;;  %v264_v8 = vld [vmem:[%s6844_s4 + $0x4a0] sm:$0xff]  ;;  %v265_v9 = vld [vmem:[%s6844_s4 + $0x4a8] sm:$0xff] }
 0x15a   :  { %4620 = vmatpush3.bf16.msra.mxu0 %v4617_v16  ;;  %4652 = vmatpush3.bf16.msra.mxu1 %v4649_v17  ;;  %v4721_v16 = vpack.c.bf16 %v215_v13, %v214_v12  ;;  %v4753_v17 = vpack.c.bf16 %v231_v15, %v230_v14  ;;  %v250_v12 = vld [vmem:[%s6844_s4 + $0x430] sm:$0xff]  ;;  %v251_v13 = vld [vmem:[%s6844_s4 + $0x438] sm:$0xff] }
 0x15b   :  { %4654 = vmatprep.subr.bf16.mxu0 %v4653_v24  ;;  %4686 = vmatprep.subr.bf16.mxu1 %v4685_v25  ;;  %v266_v14 = vld [vmem:[%s6844_s4 + $0x4b0] sm:$0xff]  ;;  %v267_v15 = vld [vmem:[%s6844_s4 + $0x4b8] sm:$0xff] }
 0x15d   :  { %4010 = vmatmul.mubr.f32.vlgmr.msra.gmra.mrb[4].mxu0 %v5508_v40  ;;  %4048 = vmatmul.mubr.f32.vlgmr.msra.gmra.mrb[4].mxu1 %v5508_v40 }
 0x15e   :  { %4012 = vmatprep.mubr.f32.mxu0 %v5511_v42  ;;  %4050 = vmatprep.mubr.f32.mxu1 %v5511_v42 }
 0x15f   :  { %4656 = vmatpush3.bf16.msra.mxu0 %v4653_v24  ;;  %4688 = vmatpush3.bf16.msra.mxu1 %v4685_v25  ;;  %v4725_v24 = vpack.c.bf16 %v217_v19, %v216_v18  ;;  %v4757_v25 = vpack.c.bf16 %v233_v23, %v232_v22  ;;  %v252_v18 = vld [vmem:[%s6844_s4 + $0x440] sm:$0xff]  ;;  %v253_v19 = vld [vmem:[%s6844_s4 + $0x448] sm:$0xff] }
 0x160   :  { %4658 = vmatprep.subr.bf16.mxu0 %v4657_v32  ;;  %4690 = vmatprep.subr.bf16.mxu1 %v4689_v34  ;;  %v268_v22 = vld [vmem:[%s6844_s4 + $0x4c0] sm:$0xff]  ;;  %v269_v23 = vld [vmem:[%s6844_s4 + $0x4c8] sm:$0xff] }
 0x161   :  { %4013 = vmatmul.mubr.f32.gmra.mrb[6].mxu0 %v5527_v49  ;;  %4051 = vmatmul.mubr.f32.gmra.mrb[6].mxu1 %v5527_v49 }
 0x162   :  { %4085 = vmatprep.mubr.f32.mxu0 %v5490_v33  ;;  %4123 = vmatprep.mubr.f32.mxu1 %v5490_v33 }
 0x163   :  { %4660 = vmatpush3.bf16.msra.mxu0 %v4657_v32  ;;  %4692 = vmatpush3.bf16.msra.mxu1 %v4689_v34  ;;  %v4729_v32 = vpack.c.bf16 %v219_v29, %v218_v26  ;;  %v4761_v34 = vpack.c.bf16 %v235_v31, %v234_v30  ;;  %v254_v26 = vld [vmem:[%s6844_s4 + $0x450] sm:$0xff]  ;;  %v255_v29 = vld [vmem:[%s6844_s4 + $0x458] sm:$0xff] }
 0x164   :  { %4662 = vmatprep.subr.bf16.mxu0 %v4661_v38  ;;  %4694 = vmatprep.subr.bf16.mxu1 %v4693_v21  ;;  %v270_v30 = vld [vmem:[%s6844_s4 + $0x4d0] sm:$0xff]  ;;  %v271_v31 = vld [vmem:[%s6844_s4 + $0x4d8] sm:$0xff] }
 0x167   :  { %4664 = vmatpush3.bf16.msra.mxu0 %v4661_v38  ;;  %4696 = vmatpush3.bf16.msra.mxu1 %v4693_v21  ;;  %v4733_v38 = vpack.c.bf16 %v221_v36, %v220_v35  ;;  %v4765_v21 = vpack.c.bf16 %v237_v20, %v236_v37  ;;  %v256_v35 = vld [vmem:[%s6844_s4 + $0x460] sm:$0xff]  ;;  %v257_v36 = vld [vmem:[%s6844_s4 + $0x468] sm:$0xff] }
 0x168   :  { %4666 = vmatprep.subr.bf16.mxu0 %v4665_v44  ;;  %4698 = vmatprep.subr.bf16.mxu1 %v4697_v45  ;;  %v272_v37 = vld [vmem:[%s6844_s4 + $0x4e0] sm:$0xff]  ;;  %v273_v20 = vld [vmem:[%s6844_s4 + $0x4e8] sm:$0xff] }
 0x16b   :  { %4668 = vmatpush3.bf16.msra.mxu0 %v4665_v44  ;;  %4700 = vmatpush3.bf16.msra.mxu1 %v4697_v45  ;;  %v4737_v44 = vpack.c.bf16 %v223_v39, %v222_v27  ;;  %v4769_v45 = vpack.c.bf16 %v239_v43, %v238_v41  ;;  %v258_v27 = vld [vmem:[%s6844_s4 + $0x470] sm:$0xff]  ;;  %v259_v39 = vld [vmem:[%s6844_s4 + $0x478] sm:$0xff] }
 0x16c   :  { %4670 = vmatprep.subr.bf16.mxu0 %v4669_v50  ;;  %4702 = vmatprep.subr.bf16.mxu1 %v4701_v51  ;;  %v274_v41 = vld [vmem:[%s6844_s4 + $0x4f0] sm:$0xff]  ;;  %v275_v43 = vld [vmem:[%s6844_s4 + $0x4f8] sm:$0xff] }
 0x16f   :  { %4672 = vmatpush3.bf16.msra.mxu0 %v4669_v50  ;;  %4704 = vmatpush3.bf16.msra.mxu1 %v4701_v51  ;;  %v4741_v50 = vpack.c.bf16 %v225_v47, %v224_v46  ;;  %v4773_v51 = vpack.c.bf16 %v241_v48, %v240_v28  ;;  %v276_v46 = vld [vmem:[%s6844_s4 + $0x500] sm:$0xff]  ;;  %v277_v47 = vld [vmem:[%s6844_s4 + $0x508] sm:$0xff] }
 0x170   :  { %4674 = vmatprep.subr.bf16.mxu0 %v4673_v56  ;;  %4706 = vmatprep.subr.bf16.mxu1 %v4705_v57  ;;  %v292_v28 = vld [vmem:[%s6844_s4 + $0x580] sm:$0xff]  ;;  %v293_v48 = vld [vmem:[%s6844_s4 + $0x588] sm:$0xff] }
 0x173   :  { %4676 = vmatpush3.bf16.msra.mxu0 %v4673_v56  ;;  %4708 = vmatpush3.bf16.msra.mxu1 %v4705_v57  ;;  %v4745_v56 = vpack.c.bf16 %v227_v53, %v226_v52  ;;  %v4777_v57 = vpack.c.bf16 %v243_v55, %v242_v54  ;;  %v278_v52 = vld [vmem:[%s6844_s4 + $0x510] sm:$0xff]  ;;  %v279_v53 = vld [vmem:[%s6844_s4 + $0x518] sm:$0xff] }
 0x174   :  { %4678 = vmatprep.subr.bf16.mxu0 %v4677_v62  ;;  %4710 = vmatprep.subr.bf16.mxu1 %v4709_v63  ;;  %v294_v54 = vld [vmem:[%s6844_s4 + $0x590] sm:$0xff]  ;;  %v295_v55 = vld [vmem:[%s6844_s4 + $0x598] sm:$0xff] }
 0x177   :  { %4680 = vmatpush3.bf16.msra.mxu0 %v4677_v62  ;;  %4712 = vmatpush3.bf16.msra.mxu1 %v4709_v63  ;;  %v4781_v62 = vpack.c.bf16 %v245_v59, %v244_v58  ;;  %v4813_v63 = vpack.c.bf16 %v261_v61, %v260_v60  ;;  %v280_v58 = vld [vmem:[%s6844_s4 + $0x520] sm:$0xff]  ;;  %v281_v59 = vld [vmem:[%s6844_s4 + $0x528] sm:$0xff] }
 0x178   :  { %4682 = vmatprep.subr.bf16.mxu0 %v4681_v4  ;;  %4714 = vmatprep.subr.bf16.mxu1 %v4713_v5  ;;  %v296_v60 = vld [vmem:[%s6844_s4 + $0x5a0] sm:$0xff]  ;;  %v297_v61 = vld [vmem:[%s6844_s4 + $0x5a8] sm:$0xff] }
 0x17b   :  { %4684 = vmatpush3.bf16.msra.mxu0 %v4681_v4  ;;  %4716 = vmatpush3.bf16.msra.mxu1 %v4713_v5  ;;  %v4785_v4 = vpack.c.bf16 %v247_v1, %v246_v0  ;;  %v4817_v5 = vpack.c.bf16 %v263_v3, %v262_v2  ;;  %v282_v0 = vld [vmem:[%s6844_s4 + $0x530] sm:$0xff]  ;;  %v283_v1 = vld [vmem:[%s6844_s4 + $0x538] sm:$0xff] }
 0x17c   :  { %4718 = vmatprep.subr.bf16.mxu0 %v4717_v10  ;;  %4750 = vmatprep.subr.bf16.mxu1 %v4749_v11  ;;  %v298_v2 = vld [vmem:[%s6844_s4 + $0x5b0] sm:$0xff]  ;;  %v299_v3 = vld [vmem:[%s6844_s4 + $0x5b8] sm:$0xff] }
 0x17e   :  { %4086 = vmatmul.mubr.f32.vlgmr.msra.gmra.mrb[8].mxu0 %v5508_v40  ;;  %4124 = vmatmul.mubr.f32.vlgmr.msra.gmra.mrb[8].mxu1 %v5508_v40 }
 0x17f   :  { %4088 = vmatprep.mubr.f32.mxu0 %v5511_v42  ;;  %4126 = vmatprep.mubr.f32.mxu1 %v5511_v42 }
 0x180   :  { %4720 = vmatpush3.bf16.msra.mxu0 %v4717_v10  ;;  %4752 = vmatpush3.bf16.msra.mxu1 %v4749_v11  ;;  %v4789_v10 = vpack.c.bf16 %v249_v7, %v248_v6  ;;  %v4821_v11 = vpack.c.bf16 %v265_v9, %v264_v8  ;;  %v284_v6 = vld [vmem:[%s6844_s4 + $0x540] sm:$0xff]  ;;  %v285_v7 = vld [vmem:[%s6844_s4 + $0x548] sm:$0xff] }
 0x181   :  { %4722 = vmatprep.subr.bf16.mxu0 %v4721_v16  ;;  %4754 = vmatprep.subr.bf16.mxu1 %v4753_v17  ;;  %v300_v8 = vld [vmem:[%s6844_s4 + $0x5c0] sm:$0xff]  ;;  %v4861_v9 = vpack.c.bf16 %v285_v7, %v284_v6 }
 0x182   :  { %4089 = vmatmul.mubr.f32.gmra.mrb[10].mxu0 %v5527_v49  ;;  %4127 = vmatmul.mubr.f32.gmra.mrb[10].mxu1 %v5527_v49 }
 0x183   :  { %4161 = vmatprep.mubr.f32.mxu0 %v5490_v33  ;;  %4199 = vmatprep.mubr.f32.mxu1 %v5490_v33 }
 0x184   :  { %4724 = vmatpush3.bf16.msra.mxu0 %v4721_v16  ;;  %4756 = vmatpush3.bf16.msra.mxu1 %v4753_v17  ;;  %v4793_v16 = vpack.c.bf16 %v251_v13, %v250_v12  ;;  %v4825_v17 = vpack.c.bf16 %v267_v15, %v266_v14  ;;  %v287_v12 = vld [vmem:[%s6844_s4 + $0x558] sm:$0xff]  ;;  %v302_v13 = vld [vmem:[%s6844_s4 + $0x5d0] sm:$0xff] }
 0x185   :  { %4726 = vmatprep.subr.bf16.mxu0 %v4725_v24  ;;  %4758 = vmatprep.subr.bf16.mxu1 %v4757_v25  ;;  %v303_v14 = vld [vmem:[%s6844_s4 + $0x5d8] sm:$0xff] }
 0x188   :  { %4728 = vmatpush3.bf16.msra.mxu0 %v4725_v24  ;;  %4760 = vmatpush3.bf16.msra.mxu1 %v4757_v25  ;;  %v4797_v24 = vpack.c.bf16 %v253_v19, %v252_v18  ;;  %v4829_v25 = vpack.c.bf16 %v269_v23, %v268_v22  ;;  %v289_v18 = vld [vmem:[%s6844_s4 + $0x568] sm:$0xff]  ;;  %v304_v19 = vld [vmem:[%s6844_s4 + $0x5e0] sm:$0xff] }
 0x189   :  { %4730 = vmatprep.subr.bf16.mxu0 %v4729_v32  ;;  %4762 = vmatprep.subr.bf16.mxu1 %v4761_v34  ;;  %v305_v22 = vld [vmem:[%s6844_s4 + $0x5e8] sm:$0xff] }
 0x18c   :  { %4732 = vmatpush3.bf16.msra.mxu0 %v4729_v32  ;;  %4764 = vmatpush3.bf16.msra.mxu1 %v4761_v34  ;;  %v4801_v32 = vpack.c.bf16 %v255_v29, %v254_v26  ;;  %v4833_v34 = vpack.c.bf16 %v271_v31, %v270_v30  ;;  %v291_v26 = vld [vmem:[%s6844_s4 + $0x578] sm:$0xff]  ;;  %v306_v29 = vld [vmem:[%s6844_s4 + $0x5f0] sm:$0xff] }
 0x18d   :  { %4734 = vmatprep.subr.bf16.mxu0 %v4733_v38  ;;  %4766 = vmatprep.subr.bf16.mxu1 %v4765_v21  ;;  %v307_v30 = vld [vmem:[%s6844_s4 + $0x5f8] sm:$0xff] }
 0x190   :  { %4736 = vmatpush3.bf16.msra.mxu0 %v4733_v38  ;;  %4768 = vmatpush3.bf16.msra.mxu1 %v4765_v21  ;;  %v4805_v38 = vpack.c.bf16 %v257_v36, %v256_v35  ;;  %v4837_v21 = vpack.c.bf16 %v273_v20, %v272_v37 }
 0x191   :  { %4738 = vmatprep.subr.bf16.mxu0 %v4737_v44  ;;  %4770 = vmatprep.subr.bf16.mxu1 %v4769_v45 }
 0x194   :  { %4740 = vmatpush3.bf16.msra.mxu0 %v4737_v44  ;;  %4772 = vmatpush3.bf16.msra.mxu1 %v4769_v45  ;;  %v4809_v44 = vpack.c.bf16 %v259_v39, %v258_v27  ;;  %v4841_v45 = vpack.c.bf16 %v275_v43, %v274_v41 }
 0x195   :  { %4742 = vmatprep.subr.bf16.mxu0 %v4741_v50  ;;  %4774 = vmatprep.subr.bf16.mxu1 %v4773_v51 }
 0x198   :  { %4744 = vmatpush3.bf16.msra.mxu0 %v4741_v50  ;;  %4776 = vmatpush3.bf16.msra.mxu1 %v4773_v51  ;;  %v4845_v50 = vpack.c.bf16 %v277_v47, %v276_v46  ;;  %v4877_v51 = vpack.c.bf16 %v293_v48, %v292_v28 }
 0x199   :  { %4746 = vmatprep.subr.bf16.mxu0 %v4745_v56  ;;  %4778 = vmatprep.subr.bf16.mxu1 %v4777_v57 }
 0x19c   :  { %4748 = vmatpush3.bf16.msra.mxu0 %v4745_v56  ;;  %4780 = vmatpush3.bf16.msra.mxu1 %v4777_v57  ;;  %v4849_v56 = vpack.c.bf16 %v279_v53, %v278_v52  ;;  %v4881_v57 = vpack.c.bf16 %v295_v55, %v294_v54 }
 0x19d   :  { %4782 = vmatprep.subr.bf16.mxu0 %v4781_v62  ;;  %4814 = vmatprep.subr.bf16.mxu1 %v4813_v63 }
 0x19f   :  { %4162 = vmatmul.mubr.f32.vlgmr.msra.gmra.mrb[12].mxu0 %v5508_v40  ;;  %4200 = vmatmul.mubr.f32.vlgmr.msra.gmra.mrb[12].mxu1 %v5508_v40 }
 0x1a0   :  { %4164 = vmatprep.mubr.f32.mxu0 %v5511_v42  ;;  %4202 = vmatprep.mubr.f32.mxu1 %v5511_v42 }
 0x1a1   :  { %4784 = vmatpush3.bf16.msra.mxu0 %v4781_v62  ;;  %4816 = vmatpush3.bf16.msra.mxu1 %v4813_v63  ;;  %v4853_v62 = vpack.c.bf16 %v281_v59, %v280_v58  ;;  %v4885_v63 = vpack.c.bf16 %v297_v61, %v296_v60 }
 0x1a2   :  { %4786 = vmatprep.subr.bf16.mxu0 %v4785_v4  ;;  %4818 = vmatprep.subr.bf16.mxu1 %v4817_v5 }
 0x1a3   :  { %4165 = vmatmul.mubr.f32.gmra.mrb[14].mxu0 %v5527_v49  ;;  %4203 = vmatmul.mubr.f32.gmra.mrb[14].mxu1 %v5527_v49 }
 0x1a4   :  { %4237 = vmatprep.mubr.f32.mxu0 %v5490_v33  ;;  %4275 = vmatprep.mubr.f32.mxu1 %v5490_v33 }
 0x1a5   :  { %4788 = vmatpush3.bf16.msra.mxu0 %v4785_v4  ;;  %4820 = vmatpush3.bf16.msra.mxu1 %v4817_v5  ;;  %v4857_v4 = vpack.c.bf16 %v283_v1, %v282_v0  ;;  %v4889_v5 = vpack.c.bf16 %v299_v3, %v298_v2 }
 0x1a6   :  { %4790 = vmatprep.subr.bf16.mxu0 %v4789_v10  ;;  %4822 = vmatprep.subr.bf16.mxu1 %v4821_v11 }
 0x1a9   :  { %4792 = vmatpush3.bf16.msra.mxu0 %v4789_v10  ;;  %4824 = vmatpush3.bf16.msra.mxu1 %v4821_v11  ;;  %v286_v11 = vld [vmem:[%s6844_s4 + $0x550] sm:$0xff] }
 0x1aa   :  { %4794 = vmatprep.subr.bf16.mxu0 %v4793_v16  ;;  %4826 = vmatprep.subr.bf16.mxu1 %v4825_v17  ;;  %v4865_v15 = vpack.c.bf16 %v287_v12, %v286_v11 }
 0x1ad   :  { %4796 = vmatpush3.bf16.msra.mxu0 %v4793_v16  ;;  %4828 = vmatpush3.bf16.msra.mxu1 %v4825_v17  ;;  %v4897_v16 = vpack.c.bf16 %v303_v14, %v302_v13  ;;  %v288_v17 = vld [vmem:[%s6844_s4 + $0x560] sm:$0xff] }
 0x1ae   :  { %4798 = vmatprep.subr.bf16.mxu0 %v4797_v24  ;;  %4830 = vmatprep.subr.bf16.mxu1 %v4829_v25  ;;  %v4869_v23 = vpack.c.bf16 %v289_v18, %v288_v17 }
 0x1b1   :  { %4800 = vmatpush3.bf16.msra.mxu0 %v4797_v24  ;;  %4832 = vmatpush3.bf16.msra.mxu1 %v4829_v25  ;;  %v4901_v24 = vpack.c.bf16 %v305_v22, %v304_v19  ;;  %v290_v25 = vld [vmem:[%s6844_s4 + $0x570] sm:$0xff] }
 0x1b2   :  { %4802 = vmatprep.subr.bf16.mxu0 %v4801_v32  ;;  %4834 = vmatprep.subr.bf16.mxu1 %v4833_v34  ;;  %v4873_v31 = vpack.c.bf16 %v291_v26, %v290_v25 }
 0x1b5   :  { %4804 = vmatpush3.bf16.msra.mxu0 %v4801_v32  ;;  %4836 = vmatpush3.bf16.msra.mxu1 %v4833_v34  ;;  %v4905_v32 = vpack.c.bf16 %v307_v30, %v306_v29 }
 0x1b6   :  { %4806 = vmatprep.subr.bf16.mxu0 %v4805_v38  ;;  %4838 = vmatprep.subr.bf16.mxu1 %v4837_v21 }
 0x1b9   :  { %4808 = vmatpush3.bf16.msra.mxu0 %v4805_v38  ;;  %4840 = vmatpush3.bf16.msra.mxu1 %v4837_v21 }
 0x1ba   :  { %4810 = vmatprep.subr.bf16.mxu0 %v4809_v44  ;;  %4842 = vmatprep.subr.bf16.mxu1 %v4841_v45 }
 0x1bd   :  { %4812 = vmatpush3.bf16.msra.mxu0 %v4809_v44  ;;  %4844 = vmatpush3.bf16.msra.mxu1 %v4841_v45 }
 0x1be   :  { %4846 = vmatprep.subr.bf16.mxu0 %v4845_v50  ;;  %4878 = vmatprep.subr.bf16.mxu1 %v4877_v51 }
 0x1c0   :  { %4238 = vmatmul.mubr.f32.vlgmr.msra.gmra.mrb[16].mxu0 %v5508_v40  ;;  %4276 = vmatmul.mubr.f32.vlgmr.msra.gmra.mrb[16].mxu1 %v5508_v40 }
 0x1c1   :  { %4240 = vmatprep.mubr.f32.mxu0 %v5511_v42  ;;  %4278 = vmatprep.mubr.f32.mxu1 %v5511_v42 }
 0x1c2   :  { %4848 = vmatpush3.bf16.msra.mxu0 %v4845_v50  ;;  %4880 = vmatpush3.bf16.msra.mxu1 %v4877_v51 }
 0x1c3   :  { %4850 = vmatprep.subr.bf16.mxu0 %v4849_v56  ;;  %4882 = vmatprep.subr.bf16.mxu1 %v4881_v57 }
 0x1c4   :  { %4241 = vmatmul.mubr.f32.gmra.mrb[18].mxu0 %v5527_v49  ;;  %4279 = vmatmul.mubr.f32.gmra.mrb[18].mxu1 %v5527_v49 }
 0x1c5   :  { %4313 = vmatprep.mubr.f32.mxu0 %v5490_v33  ;;  %4351 = vmatprep.mubr.f32.mxu1 %v5490_v33  ;;  %v301_v33 = vld [vmem:[%s6844_s4 + $0x5c8] sm:$0xff] }
 0x1c6   :  { %4852 = vmatpush3.bf16.msra.mxu0 %v4849_v56  ;;  %4884 = vmatpush3.bf16.msra.mxu1 %v4881_v57  ;;  %v4893_v10 = vpack.c.bf16 %v301_v33, %v300_v8 }
 0x1c7   :  { %4854 = vmatprep.subr.bf16.mxu0 %v4853_v62  ;;  %4886 = vmatprep.subr.bf16.mxu1 %v4885_v63 }
 0x1ca   :  { %4856 = vmatpush3.bf16.msra.mxu0 %v4853_v62  ;;  %4888 = vmatpush3.bf16.msra.mxu1 %v4885_v63 }
 0x1cb   :  { %4858 = vmatprep.subr.bf16.mxu0 %v4857_v4  ;;  %4890 = vmatprep.subr.bf16.mxu1 %v4889_v5 }
 0x1ce   :  { %4860 = vmatpush3.bf16.msra.mxu0 %v4857_v4  ;;  %4892 = vmatpush3.bf16.msra.mxu1 %v4889_v5 }
 0x1cf   :  { %4862 = vmatprep.subr.bf16.mxu0 %v4861_v9  ;;  %4894 = vmatprep.subr.bf16.mxu1 %v4893_v10 }
 0x1d2   :  { %4864 = vmatpush3.bf16.msra.mxu0 %v4861_v9  ;;  %4896 = vmatpush3.bf16.msra.mxu1 %v4893_v10 }
 0x1d3   :  { %4866 = vmatprep.subr.bf16.mxu0 %v4865_v15  ;;  %4898 = vmatprep.subr.bf16.mxu1 %v4897_v16 }
 0x1d6   :  { %4868 = vmatpush3.bf16.msra.mxu0 %v4865_v15  ;;  %4900 = vmatpush3.bf16.msra.mxu1 %v4897_v16 }
 0x1d7   :  { %4870 = vmatprep.subr.bf16.mxu0 %v4869_v23  ;;  %4902 = vmatprep.subr.bf16.mxu1 %v4901_v24 }
 0x1da   :  { %4872 = vmatpush3.bf16.msra.mxu0 %v4869_v23  ;;  %4904 = vmatpush3.bf16.msra.mxu1 %v4901_v24 }
 0x1db   :  { %4874 = vmatprep.subr.bf16.mxu0 %v4873_v31  ;;  %4906 = vmatprep.subr.bf16.mxu1 %v4905_v32 }
 0x1de   :  { %4876 = vmatpush3.bf16.msra.mxu0 %v4873_v31  ;;  %4908 = vmatpush3.bf16.msra.mxu1 %v4905_v32 }
 0x1e1   :  { %4314 = vmatmul.mubr.f32.vlgmr.msra.gmra.mrb[20].mxu0 %v5508_v40  ;;  %4352 = vmatmul.mubr.f32.vlgmr.msra.gmra.mrb[20].mxu1 %v5508_v40 }
 0x1e2   :  { %4316 = vmatprep.mubr.f32.mxu0 %v5511_v42  ;;  %4354 = vmatprep.mubr.f32.mxu1 %v5511_v42 }
 0x1e5   :  { %4317 = vmatmul.mubr.f32.gmra.mrb[22].mxu0 %v5527_v49  ;;  %4355 = vmatmul.mubr.f32.gmra.mrb[22].mxu1 %v5527_v49 }
 0x210   :  { %v3935_v34 = vpop.f32.mrb[0].mxu0  ;;  %v3973_v35 = vpop.f32.mrb[0].mxu1 }
 0x211   :  { %v374_v36 = vpop.f32.mrb[1].mxu0  ;;  %v459_v37 = vpop.f32.mrb[1].mxu1 }
 0x212   :  { %4365 = vmatprep.mubr.msk.f32.mxu1 %vm1328_vm0, %v374_v36  ;;  %v6084_v36 = vld [vmem:[%s6841_s1 + $0x8] sm:$0xff] }
 0x214   :  { %v3938_v20 = vpop.f32.mrb[2].mxu0  ;;  %v3976_v38 = vpop.f32.mrb[2].mxu1 }
 0x215   :  { %v384_v21 = vpop.f32.mrb[3].mxu0  ;;  %v469_v27 = vpop.f32.mrb[3].mxu1 }
 0x230   :  { %v4011_v40 = vpop.f32.mrb[4].mxu0  ;;  %v4049_v39 = vpop.f32.mrb[4].mxu1 }
 0x231   :  { %v544_v41 = vpop.f32.mrb[5].mxu0  ;;  %v629_v43 = vpop.f32.mrb[5].mxu1 }
 0x232   :  { %4393 = vmatprep.mubr.msk.f32.mxu0 %vm1328_vm0, %v544_v41  ;;  %v6100_v41 = vld [vmem:[%s6841_s1 + $0x18] sm:$0xff] }
 0x234   :  { %v4014_v42 = vpop.f32.mrb[6].mxu0  ;;  %v4052_v44 = vpop.f32.mrb[6].mxu1 }
 0x235   :  { %v554_v49 = vpop.f32.mrb[7].mxu0  ;;  %v639_v45 = vpop.f32.mrb[7].mxu1 }
 0x251   :  { %v4087_v46 = vpop.f32.mrb[8].mxu0  ;;  %v4125_v47 = vpop.f32.mrb[8].mxu1 }
 0x252   :  { %v714_v28 = vpop.f32.mrb[9].mxu0  ;;  %v799_v48 = vpop.f32.mrb[9].mxu1 }
 0x253   :  { %v4909_v51 = vpack.c.bf16 %v4087_v46, %v714_v28  ;;  %v4921_v52 = vpack.c.bf16 %v4125_v47, %v799_v48 }
 0x255   :  { %v4090_v53 = vpop.f32.mrb[10].mxu0  ;;  %v4128_v54 = vpop.f32.mrb[10].mxu1  ;;  %4911 = vmatprep.subr.msk.bf16.mxu1 %vm6021_vm1, %v4909_v51 }
 0x256   :  { %v724_v55 = vpop.f32.mrb[11].mxu0  ;;  %v809_v56 = vpop.f32.mrb[11].mxu1  ;;  %4914 = vmatpush3.bf16.xpose.msk.msra.mxu1 %vm6021_vm1, %v4909_v51 }
 0x257   :  { %v4915_v57 = vpack.c.bf16 %v4090_v53, %v724_v55  ;;  %v4927_v58 = vpack.c.bf16 %v4128_v54, %v809_v56 }
 0x259   :  { %4917 = vmatprep.subr.msk.bf16.mxu1 %vm6021_vm1, %v4915_v57 }
 0x25e   :  { %4920 = vmatpush3.bf16.xpose.msk.msra.mxu1 %vm6021_vm1, %v4915_v57 }
 0x25f   :  { %4923 = vmatprep.subr.msk.bf16.mxu1 %vm6021_vm1, %v4921_v52 }
 0x265   :  { %4366 = vmatmul.mubr.msk.f32.vlgmr.msra.gmra.mrb[24].mxu1 %vm1328_vm0, %v3935_v34 }
 0x266   :  { %4368 = vmatprep.mubr.msk.f32.mxu1 %vm1328_vm0, %v384_v21  ;;  %4926 = vmatpush3.bf16.xpose.msk.msra.mxu1 %vm6021_vm1, %v4921_v52 }
 0x267   :  { %4929 = vmatprep.subr.msk.bf16.mxu1 %vm6021_vm1, %v4927_v58 }
 0x269   :  { %4369 = vmatmul.mubr.msk.f32.gmra.mrb[26].mxu1 %vm1328_vm0, %v3938_v20 }
 0x26a   :  { %4379 = vmatprep.mubr.msk.f32.mxu1 %vm1328_vm0, %v459_v37 }
 0x26e   :  { %4932 = vmatpush3.bf16.xpose.msk.msra.mxu1 %vm6021_vm1, %v4927_v58 }
 0x272   :  { %v4163_v59 = vpop.f32.mrb[12].mxu0  ;;  %v4201_v60 = vpop.f32.mrb[12].mxu1 }
 0x273   :  { %v884_v61 = vpop.f32.mrb[13].mxu0  ;;  %v969_v62 = vpop.f32.mrb[13].mxu1 }
 0x274   :  { %v4933_v63 = vpack.c.bf16 %v4163_v59, %v884_v61  ;;  %v4945_v0 = vpack.c.bf16 %v4201_v60, %v969_v62 }
 0x275   :  { %4380 = vmatmul.mubr.msk.f32.vlgmr.msra.gmra.mrb[28].mxu1 %vm1328_vm0, %v3973_v35 }
 0x276   :  { %v4166_v1 = vpop.f32.mrb[14].mxu0  ;;  %v4204_v2 = vpop.f32.mrb[14].mxu1  ;;  %4935 = vmatprep.subr.msk.bf16.mxu0 %vm6021_vm1, %v4933_v63  ;;  %4947 = vmatprep.subr.msk.bf16.mxu1 %vm6021_vm1, %v4945_v0 }
 0x277   :  { %v894_v3 = vpop.f32.mrb[15].mxu0  ;;  %v979_v4 = vpop.f32.mrb[15].mxu1  ;;  %4382 = vmatprep.mubr.msk.f32.mxu1 %vm1328_vm0, %v469_v27  ;;  %4938 = vmatpush3.bf16.xpose.msk.msra.mxu0 %vm6021_vm1, %v4933_v63 }
 0x278   :  { %v4939_v5 = vpack.c.bf16 %v4166_v1, %v894_v3  ;;  %v4951_v6 = vpack.c.bf16 %v4204_v2, %v979_v4  ;;  %4950 = vmatpush3.bf16.xpose.msk.msra.mxu1 %vm6021_vm1, %v4945_v0 }
 0x279   :  { %4383 = vmatmul.mubr.msk.f32.gmra.mrb[30].mxu1 %vm1328_vm0, %v3976_v38  ;;  %v6089_v38 = vld [vmem:[%s6841_s1] sm:$0xff] }
 0x27a   :  { %4941 = vmatprep.subr.msk.bf16.mxu0 %vm6021_vm1, %v4939_v5  ;;  %4953 = vmatprep.subr.msk.bf16.mxu1 %vm6021_vm1, %v4951_v6 }
 0x27b   :  { %4407 = vmatprep.mubr.msk.f32.mxu1 %vm1328_vm0, %v629_v43 }
 0x27f   :  { %4944 = vmatpush3.bf16.xpose.msk.msra.mxu0 %vm6021_vm1, %v4939_v5 }
 0x280   :  { %4956 = vmatpush3.bf16.xpose.msk.msra.mxu1 %vm6021_vm1, %v4951_v6 }
 0x286   :  { %4394 = vmatmul.mubr.msk.f32.vlgmr.msra.gmra.mrb[24].mxu0 %vm1328_vm0, %v4011_v40 }
 0x287   :  { %4408 = vmatmul.mubr.msk.f32.vlgmr.msra.gmra.mrb[32].mxu1 %vm1328_vm0, %v4049_v39  ;;  %4396 = vmatprep.mubr.msk.f32.mxu0 %vm1328_vm0, %v554_v49  ;;  %v6107_v49 = vld [vmem:[%s6841_s1 + $0x10] sm:$0xff] }
 0x288   :  { %4410 = vmatprep.mubr.msk.f32.mxu1 %vm1328_vm0, %v639_v45 }
 0x28a   :  { %4397 = vmatmul.mubr.msk.f32.gmra.mrb[26].mxu0 %vm1328_vm0, %v4014_v42 }
 0x28b   :  { %4411 = vmatmul.mubr.msk.f32.gmra.mrb[34].mxu1 %vm1328_vm0, %v4052_v44 }
 0x293   :  { %v4239_v7 = vpop.f32.mrb[16].mxu0  ;;  %v4277_v8 = vpop.f32.mrb[16].mxu1 }
 0x294   :  { %v1054_v33 = vpop.f32.mrb[17].mxu0  ;;  %v1139_v9 = vpop.f32.mrb[17].mxu1 }
 0x295   :  { %v4957_v10 = vpack.c.bf16 %v4239_v7, %v1054_v33  ;;  %v4965_v11 = vpack.c.bf16 %v4277_v8, %v1139_v9 }
 0x297   :  { %v4242_v12 = vpop.f32.mrb[18].mxu0  ;;  %v4280_v13 = vpop.f32.mrb[18].mxu1  ;;  %4958 = vmatprep.subr.bf16.mxu0 %v4957_v10  ;;  %4966 = vmatprep.subr.bf16.mxu1 %v4965_v11 }
 0x298   :  { %v1064_v14 = vpop.f32.mrb[19].mxu0  ;;  %v1149_v15 = vpop.f32.mrb[19].mxu1  ;;  %4960 = vmatpush3.bf16.msra.mxu0 %v4957_v10  ;;  %4968 = vmatpush3.bf16.msra.mxu1 %v4965_v11 }
 0x299   :  { %v4961_v16 = vpack.c.bf16 %v4242_v12, %v1064_v14  ;;  %v4969_v17 = vpack.c.bf16 %v4280_v13, %v1149_v15 }
 0x29b   :  { %4962 = vmatprep.subr.bf16.mxu0 %v4961_v16  ;;  %4970 = vmatprep.subr.bf16.mxu1 %v4969_v17 }
 0x29c   :  { %4964 = vmatpush3.bf16.msra.mxu0 %v4961_v16  ;;  %4972 = vmatpush3.bf16.msra.mxu1 %v4969_v17 }
 0x2b4   :  { %v4315_v18 = vpop.f32.mrb[20].mxu0  ;;  %v4353_v19 = vpop.f32.mrb[20].mxu1 }
 0x2b5   :  { %v1224_v22 = vpop.f32.mrb[21].mxu0  ;;  %v1309_v23 = vpop.f32.mrb[21].mxu1 }
 0x2b6   :  { %v6071_v24 = vpack.c.bf16 %v4315_v18, %v1224_v22  ;;  %v6073_v25 = vpack.c.bf16 %v4353_v19, %v1309_v23 }
 0x2b8   :  { %v4318_v26 = vpop.f32.mrb[22].mxu0  ;;  %v4356_v29 = vpop.f32.mrb[22].mxu1  ;;  %4974 = vmatprep.subr.bf16.mxu0 %v6071_v24  ;;  %4982 = vmatprep.subr.bf16.mxu1 %v6073_v25 }
 0x2b9   :  { %v1234_v30 = vpop.f32.mrb[23].mxu0  ;;  %v1319_v31 = vpop.f32.mrb[23].mxu1 }
 0x2ba   :  { %v6077_v32 = vpack.c.bf16 %v4318_v26, %v1234_v30  ;;  %v6079_v34 = vpack.c.bf16 %v4356_v29, %v1319_v31 }
 0x338   :  { %v4367_v35 = vpop.f32.mrb[24].mxu1 }
 0x339   :  { %v1766_v37 = vmul.f32 0.17677669, %v4367_v35  ;;  %v1419_v20 = vpop.f32.mrb[25].mxu1 }
 0x33a   :  { %v1765_v21 = vmul.f32 0.17677669, %v1419_v20 }
 0x33b   :  { %v6092_v27 = vadd.f32 %v6084_v36, %v1766_v37 }
 0x33c   :  { %v4370_v40 = vpop.f32.mrb[26].mxu1  ;;  %v6095_v39 = vadd.f32 %v6089_v38, %v1765_v21 }
 0x33d   :  { %v1768_v43 = vmul.f32 0.17677669, %v4370_v40  ;;  %v1429_v42 = vpop.f32.mrb[27].mxu1  ;;  %v1804_v44 = vsel %vm1328_vm0, %v6092_v27, -inf }
 0x33e   :  { %v1767_v45 = vmul.f32 0.17677669, %v1429_v42  ;;  %1805 = vmax.xlane.f32.xlu1 %v1804_v44  ;;  %v1801_v46 = vsel %vm1328_vm0, %v6095_v39, -inf }
 0x33f   :  { %1802 = vmax.xlane.f32.xlu0 %v1801_v46  ;;  %v6112_v47 = vadd.f32 %v6100_v41, %v1768_v43 }
 0x340   :  { %v6115_v28 = vadd.f32 %v6107_v49, %v1767_v45 }
 0x341   :  { %v1810_v48 = vsel %vm1328_vm0, %v6112_v47, -inf }
 0x342   :  { %1811 = vmax.xlane.f32.xlu1 %v1810_v48  ;;  %v1807_v50 = vsel %vm1328_vm0, %v6115_v28, -inf }
 0x343   :  { %1808 = vmax.xlane.f32.xlu0 %v1807_v50 }
 0x348   :  { %v4381_v51 = vpop.f32.mrb[28].mxu1 }
 0x349   :  { %v1770_v52 = vmul.f32 0.17677669, %v4381_v51  ;;  %v1528_v53 = vpop.f32.mrb[29].mxu1 }
 0x34a   :  { %v1769_v54 = vmul.f32 0.17677669, %v1528_v53 }
 0x34b   :  { %v6122_v55 = vadd.f32 %v6084_v36, %v1770_v52 }
 0x34c   :  { %v4384_v56 = vpop.f32.mrb[30].mxu1  ;;  %v6125_v57 = vadd.f32 %v6089_v38, %v1769_v54 }
 0x34d   :  { %v1772_v58 = vmul.f32 0.17677669, %v4384_v56  ;;  %v1538_v59 = vpop.f32.mrb[31].mxu1  ;;  %v1816_v60 = vsel %vm1328_vm0, %v6122_v55, -inf }
 0x34e   :  { %v1771_v61 = vmul.f32 0.17677669, %v1538_v59  ;;  %1817 = vmax.xlane.f32.xlu1 %v1816_v60  ;;  %v1813_v62 = vsel %vm1328_vm0, %v6125_v57, -inf }
 0x34f   :  { %1814 = vmax.xlane.f32.xlu0 %v1813_v62  ;;  %v6132_v63 = vadd.f32 %v6100_v41, %v1772_v58 }
 0x350   :  { %v6135_v0 = vadd.f32 %v6107_v49, %v1771_v61 }
 0x351   :  { %v1822_v1 = vsel %vm1328_vm0, %v6132_v63, -inf }
 0x352   :  { %1823 = vmax.xlane.f32.xlu1 %v1822_v1  ;;  %v1819_v2 = vsel %vm1328_vm0, %v6135_v0, -inf }
 0x353   :  { %1820 = vmax.xlane.f32.xlu0 %v1819_v2 }
 0x359   :  { %v4395_v3 = vpop.f32.mrb[24].mxu0 }
 0x35a   :  { %v1774_v4 = vmul.f32 0.17677669, %v4395_v3  ;;  %v4409_v5 = vpop.f32.mrb[32].mxu1  ;;  %v1637_v6 = vpop.f32.mrb[25].mxu0 }
 0x35b   :  { %v1773_v7 = vmul.f32 0.17677669, %v1637_v6  ;;  %v1746_v8 = vpop.f32.mrb[33].mxu1  ;;  %v1778_v9 = vmul.f32 0.17677669, %v4409_v5 }
 0x35c   :  { %v6142_v33 = vadd.f32 %v6084_v36, %v1774_v4  ;;  %v1777_v16 = vmul.f32 0.17677669, %v1746_v8 }
 0x35d   :  { %v4398_v10 = vpop.f32.mrb[26].mxu0  ;;  %v6145_v11 = vadd.f32 %v6089_v38, %v1773_v7  ;;  %v6160_v30 = vadd.f32 %v6084_v36, %v1778_v9 }
 0x35e   :  { %v1776_v12 = vmul.f32 0.17677669, %v4398_v10  ;;  %v4412_v13 = vpop.f32.mrb[34].mxu1  ;;  %v1647_v14 = vpop.f32.mrb[27].mxu0  ;;  %v1828_v15 = vsel %vm1328_vm0, %v6142_v33, -inf  ;;  %v6165_v37 = vadd.f32 %v6089_v38, %v1777_v16 }
 0x35f   :  { %v1775_v17 = vmul.f32 0.17677669, %v1647_v14  ;;  %v1756_v18 = vpop.f32.mrb[35].mxu1  ;;  %1829 = vmax.xlane.f32.xlu1 %v1828_v15  ;;  %v1825_v19 = vsel %vm1328_vm0, %v6145_v11, -inf  ;;  %v1780_v26 = vmul.f32 0.17677669, %v4412_v13 }
 0x360   :  { %1826 = vmax.xlane.f32.xlu0 %v1825_v19  ;;  %v6152_v22 = vadd.f32 %v6100_v41, %v1776_v12  ;;  %v1779_v31 = vmul.f32 0.17677669, %v1756_v18  ;;  %v1840_v20 = vsel %vm1328_vm0, %v6160_v30, -inf  ;;  %v1837_v36 = vsel %vm1328_vm0, %v6165_v37, -inf }
 0x361   :  { %v6155_v23 = vadd.f32 %v6107_v49, %v1775_v17  ;;  %v6170_v21 = vadd.f32 %v6100_v41, %v1780_v26 }
 0x362   :  { %v1834_v29 = vsel %vm1328_vm0, %v6152_v22, -inf  ;;  %v6175_v40 = vadd.f32 %v6107_v49, %v1779_v31 }
 0x363   :  { %1835 = vmax.xlane.f32.xlu1 %v1834_v29  ;;  %v1831_v35 = vsel %vm1328_vm0, %v6155_v23, -inf  ;;  %v1846_v43 = vsel %vm1328_vm0, %v6170_v21, -inf }
 0x364   :  { %1832 = vmax.xlane.f32.xlu0 %v1831_v35  ;;  %v1843_v38 = vsel %vm1328_vm0, %v6175_v40, -inf }
 0x367   :  { %1841 = vmax.xlane.f32.xlu1 %v1840_v20 }
 0x368   :  { %1838 = vmax.xlane.f32.xlu0 %v1837_v36 }
 0x36b   :  { %1847 = vmax.xlane.f32.xlu1 %v1846_v43 }
 0x36c   :  { %1844 = vmax.xlane.f32.xlu0 %v1843_v38 }
 0x3cb   :  { %v1806_v42 = vpop.xlane.xlu1 %1805 }
 0x3cc   :  { %v1850_v41 = vsub.f32 %v6092_v27, %v1806_v42  ;;  %v1803_v44 = vpop.xlane.xlu0 %1802 }
 0x3cd   :  { %v1849_v45 = vsub.f32 %v6095_v39, %v1803_v44 }
 0x3ce   :  { %v1867_v46 = vmul.f32 1.442695, %v1850_v41 }
 0x3cf   :  { %v1865_v48 = vmul.f32 1.442695, %v1849_v45  ;;  %v1812_v50 = vpop.xlane.xlu1 %1811 }
 0x3d0   :  { %5173 = vpow2.f32 %v1867_v46  ;;  %v1852_v49 = vsub.f32 %v6112_v47, %v1812_v50  ;;  %v1809_v51 = vpop.xlane.xlu0 %1808 }
 0x3d1   :  { %5175 = vpow2.f32 %v1865_v48  ;;  %v1851_v52 = vsub.f32 %v6115_v28, %v1809_v51 }
 0x3d2   :  { %v1871_v53 = vmul.f32 1.442695, %v1852_v49 }
 0x3d3   :  { %v1869_v54 = vmul.f32 1.442695, %v1851_v52 }
 0x3d4   :  { %5177 = vpow2.f32 %v1871_v53 }
 0x3d5   :  { %5179 = vpow2.f32 %v1869_v54 }
 0x3da   :  { %v6185_v56 = vpop.eup %5173 }
 0x3db   :  { %v6187_v27 = vpop.eup %5175  ;;  %v1818_v58 = vpop.xlane.xlu1 %1817  ;;  %v1900_v39 = vsel %vm1328_vm0, %v6185_v56, 0.0 }
 0x3dc   :  { %v1854_v59 = vsub.f32 %v6122_v55, %v1818_v58  ;;  %v1815_v60 = vpop.xlane.xlu0 %1814  ;;  %1901 = vadd.xlane.f32.xlu1 %v1900_v39  ;;  %v1897_v47 = vsel %vm1328_vm0, %v6187_v27, 0.0 }
 0x3dd   :  { %v1853_v28 = vsub.f32 %v6125_v57, %v1815_v60  ;;  %1898 = vadd.xlane.f32.xlu0 %v1897_v47 }
 0x3de   :  { %v6195_v61 = vpop.eup %5177  ;;  %v1875_v62 = vmul.f32 1.442695, %v1854_v59 }
 0x3df   :  { %v6197_v1 = vpop.eup %5179  ;;  %v1873_v2 = vmul.f32 1.442695, %v1853_v28  ;;  %v1824_v3 = vpop.xlane.xlu1 %1823  ;;  %v1906_v4 = vsel %vm1328_vm0, %v6195_v61, 0.0 }
 0x3e0   :  { %5181 = vpow2.f32 %v1875_v62  ;;  %v1856_v55 = vsub.f32 %v6132_v63, %v1824_v3  ;;  %v1821_v5 = vpop.xlane.xlu0 %1820  ;;  %1907 = vadd.xlane.f32.xlu1 %v1906_v4  ;;  %v1903_v6 = vsel %vm1328_vm0, %v6197_v1, 0.0 }
 0x3e1   :  { %5183 = vpow2.f32 %v1873_v2  ;;  %v1855_v57 = vsub.f32 %v6135_v0, %v1821_v5  ;;  %1904 = vadd.xlane.f32.xlu0 %v1903_v6 }
 0x3e2   :  { %v1879_v7 = vmul.f32 1.442695, %v1856_v55 }
 0x3e3   :  { %v1877_v8 = vmul.f32 1.442695, %v1855_v57 }
 0x3e4   :  { %5185 = vpow2.f32 %v1879_v7 }
 0x3e5   :  { %5187 = vpow2.f32 %v1877_v8 }
 0x3ea   :  { %v6205_v9 = vpop.eup %5181 }
 0x3eb   :  { %v6207_v10 = vpop.eup %5183  ;;  %v1912_v63 = vsel %vm1328_vm0, %v6205_v9, 0.0 }
 0x3ec   :  { %v1830_v12 = vpop.xlane.xlu1 %1829  ;;  %1913 = vadd.xlane.f32.xlu1 %v1912_v63  ;;  %v1909_v13 = vsel %vm1328_vm0, %v6207_v10, 0.0 }
 0x3ed   :  { %v1858_v14 = vsub.f32 %v6142_v33, %v1830_v12  ;;  %v1827_v0 = vpop.xlane.xlu0 %1826  ;;  %1910 = vadd.xlane.f32.xlu0 %v1909_v13  ;;  %v2365_v12 = vld [vmem:[%s6845_s5] sm:$0xff]  ;;  %v2366_v13 = vld [vmem:[%s6845_s5 + $0x8] sm:$0xff] }
 0x3ee   :  { %v6214_v15 = vpop.eup %5185  ;;  %v1857_v16 = vsub.f32 %v6145_v11, %v1827_v0 }
 0x3ef   :  { %v6217_v17 = vpop.eup %5187  ;;  %v1883_v18 = vmul.f32 1.442695, %v1858_v14  ;;  %v1918_v19 = vsel %vm1328_vm0, %v6214_v15, 0.0 }
 0x3f0   :  { %v1881_v26 = vmul.f32 1.442695, %v1857_v16  ;;  %v1836_v29 = vpop.xlane.xlu1 %1835  ;;  %1919 = vadd.xlane.f32.xlu1 %v1918_v19  ;;  %v1915_v31 = vsel %vm1328_vm0, %v6217_v17, 0.0 }
 0x3f1   :  { %5189 = vpow2.f32 %v1883_v18  ;;  %v1860_v33 = vsub.f32 %v6152_v22, %v1836_v29  ;;  %v1833_v35 = vpop.xlane.xlu0 %1832  ;;  %1916 = vadd.xlane.f32.xlu0 %v1915_v31  ;;  %v4989_v18 = vpack.c.bf16 %v2366_v13, %v2365_v12  ;;  %v2378_v12 = vld [vmem:[%s6845_s5 + $0x68] sm:$0xff] }
 0x3f2   :  { %5191 = vpow2.f32 %v1881_v26  ;;  %v1859_v11 = vsub.f32 %v6155_v23, %v1833_v35 }
 0x3f3   :  { %v1887_v20 = vmul.f32 1.442695, %v1860_v33 }
 0x3f4   :  { %v1885_v36 = vmul.f32 1.442695, %v1859_v11  ;;  %v1842_v43 = vpop.xlane.xlu1 %1841 }
 0x3f5   :  { %5193 = vpow2.f32 %v1887_v20  ;;  %v1862_v38 = vsub.f32 %v6160_v30, %v1842_v43  ;;  %v1839_v42 = vpop.xlane.xlu0 %1838  ;;  %v2368_v43 = vld [vmem:[%s6845_s5 + $0x18] sm:$0xff] }
 0x3f6   :  { %5195 = vpow2.f32 %v1885_v36  ;;  %v1861_v41 = vsub.f32 %v6165_v37, %v1839_v42 }
 0x3f7   :  { %v1891_v44 = vmul.f32 1.442695, %v1862_v38 }
 0x3f8   :  { %v1889_v45 = vmul.f32 1.442695, %v1861_v41  ;;  %v1848_v46 = vpop.xlane.xlu1 %1847 }
 0x3f9   :  { %5197 = vpow2.f32 %v1891_v44  ;;  %v1864_v22 = vsub.f32 %v6170_v21, %v1848_v46  ;;  %v1845_v48 = vpop.xlane.xlu0 %1844 }
 0x3fa   :  { %5199 = vpow2.f32 %v1889_v45  ;;  %v1863_v23 = vsub.f32 %v6175_v40, %v1845_v48 }
 0x3fb   :  { %v6229_v50 = vpop.eup %5189  ;;  %v1895_v49 = vmul.f32 1.442695, %v1864_v22 }
 0x3fc   :  { %v6231_v51 = vpop.eup %5191  ;;  %v1893_v30 = vmul.f32 1.442695, %v1863_v23  ;;  %v1924_v52 = vsel %vm1328_vm0, %v6229_v50, 0.0 }
 0x3fd   :  { %5201 = vpow2.f32 %v1895_v49  ;;  %1925 = vadd.xlane.f32.xlu1 %v1924_v52  ;;  %v1921_v37 = vsel %vm1328_vm0, %v6231_v51, 0.0 }
 0x3fe   :  { %5203 = vpow2.f32 %v1893_v30  ;;  %1922 = vadd.xlane.f32.xlu0 %v1921_v37 }
 0x3ff   :  { %v6237_v21 = vpop.eup %5193 }
 0x400   :  { %v6239_v53 = vpop.eup %5195  ;;  %v1930_v40 = vsel %vm1328_vm0, %v6237_v21, 0.0 }
 0x401   :  { %1931 = vadd.xlane.f32.xlu1 %v1930_v40  ;;  %v1927_v54 = vsel %vm1328_vm0, %v6239_v53, 0.0  ;;  %v2369_v40 = vld [vmem:[%s6845_s5 + $0x20] sm:$0xff] }
 0x402   :  { %1928 = vadd.xlane.f32.xlu0 %v1927_v54  ;;  %v2370_v54 = vld [vmem:[%s6845_s5 + $0x28] sm:$0xff] }
 0x403   :  { %v6245_v58 = vpop.eup %5197 }
 0x404   :  { %v6247_v39 = vpop.eup %5199  ;;  %v1936_v59 = vsel %vm1328_vm0, %v6245_v58, 0.0 }
 0x405   :  { %1937 = vadd.xlane.f32.xlu1 %v1936_v59  ;;  %v1933_v60 = vsel %vm1328_vm0, %v6247_v39, 0.0  ;;  %v2372_v59 = vld [vmem:[%s6845_s5 + $0x38] sm:$0xff] }
 0x406   :  { %1934 = vadd.xlane.f32.xlu0 %v1933_v60 }
 0x407   :  { %v6253_v47 = vpop.eup %5201 }
 0x408   :  { %v6255_v28 = vpop.eup %5203  ;;  %v1942_v62 = vsel %vm1328_vm0, %v6253_v47, 0.0 }
 0x409   :  { %1943 = vadd.xlane.f32.xlu1 %v1942_v62  ;;  %v1939_v2 = vsel %vm1328_vm0, %v6255_v28, 0.0  ;;  %v2373_v62 = vld [vmem:[%s6845_s5 + $0x40] sm:$0xff] }
 0x40a   :  { %1940 = vadd.xlane.f32.xlu0 %v1939_v2  ;;  %v2374_v2 = vld [vmem:[%s6845_s5 + $0x48] sm:$0xff] }
 0x469   :  { %v1902_v3 = vpop.xlane.xlu1 %1901 }
 0x46a   :  { %5205 = vrcp.f32 %v1902_v3  ;;  %v1899_v4 = vpop.xlane.xlu0 %1898 }
 0x46b   :  { %5207 = vrcp.f32 %v1899_v4 }
 0x46d   :  { %v1908_v55 = vpop.xlane.xlu1 %1907 }
 0x46e   :  { %5209 = vrcp.f32 %v1908_v55  ;;  %v1905_v5 = vpop.xlane.xlu0 %1904  ;;  %v5005_v55 = vpack.c.bf16 %v2374_v2, %v2373_v62  ;;  %v2876_v2 = vld [vmem:[%s6849_s9 + $0x70] sm:$0xff] }
 0x46f   :  { %5211 = vrcp.f32 %v1905_v5  ;;  %v2375_v5 = vld [vmem:[%s6845_s5 + $0x50] sm:$0xff] }
 0x474   :  { %v5206_v6 = vpop.eup %5205 }
 0x475   :  { %v5208_v57 = vpop.eup %5207  ;;  %v1948_v8 = vmul.f32 %v5206_v6, %v6185_v56  ;;  %v2376_v6 = vld [vmem:[%s6845_s5 + $0x58] sm:$0xff] }
 0x476   :  { %v1946_v7 = vmul.f32 %v5208_v57, %v6187_v27 }
 0x478   :  { %v5210_v63 = vpop.eup %5209  ;;  %4421 = vmatprep.mubr.msk.f32.mxu0 %vm1328_vm0, %v1946_v7 }
 0x479   :  { %v5212_v14 = vpop.eup %5211  ;;  %v1914_v0 = vpop.xlane.xlu1 %1913  ;;  %4422 = vmatmul.mubr.msk.f32.vlgmr.msra.gmra.mrb[28].mxu0 %vm1328_vm0, %v1948_v8  ;;  %v1952_v16 = vmul.f32 %v5210_v63, %v6195_v61  ;;  %v5009_v8 = vpack.c.bf16 %v2376_v6, %v2375_v5  ;;  %v2377_v63 = vld [vmem:[%s6845_s5 + $0x60] sm:$0xff]  ;;  %v2881_v6 = vld [vmem:[%s6849_s9 + $0x98] sm:$0xff] }
 0x47a   :  { %5213 = vrcp.f32 %v1914_v0  ;;  %4976 = vmatpush3.bf16.msra.mxu0 %v6071_v24  ;;  %v1911_v27 = vpop.xlane.xlu0 %1910  ;;  %v1950_v56 = vmul.f32 %v5212_v14, %v6197_v1  ;;  %v5013_v0 = vpack.c.bf16 %v2378_v12, %v2377_v63  ;;  %v2882_v63 = vld [vmem:[%s6849_s9 + $0xa0] sm:$0xff]  ;;  %v2880_v12 = vld [vmem:[%s6849_s9 + $0x90] sm:$0xff] }
 0x47b   :  { %4978 = vmatprep.subr.bf16.mxu0 %v6077_v32  ;;  %5215 = vrcp.f32 %v1911_v27  ;;  %v2379_v27 = vld [vmem:[%s6845_s5 + $0x70] sm:$0xff] }
 0x47c   :  { %4424 = vmatprep.mubr.msk.f32.mxu0 %vm1328_vm0, %v1950_v56  ;;  %v2380_v56 = vld [vmem:[%s6845_s5 + $0x78] sm:$0xff] }
 0x47d   :  { %v1920_v19 = vpop.xlane.xlu1 %1919  ;;  %4425 = vmatmul.mubr.msk.f32.gmra.mrb[30].mxu0 %vm1328_vm0, %v1952_v16 }
 0x47e   :  { %5217 = vrcp.f32 %v1920_v19  ;;  %4980 = vmatpush3.bf16.msra.mxu0 %v6077_v32  ;;  %v1917_v26 = vpop.xlane.xlu0 %1916  ;;  %v5017_v19 = vpack.c.bf16 %v2380_v56, %v2379_v27 }
 0x47f   :  { %5219 = vrcp.f32 %v1917_v26  ;;  %4990 = vmatprep.subr.bf16.mxu0 %v4989_v18 }
 0x484   :  { %v5214_v24 = vpop.eup %5213 }
 0x485   :  { %v5216_v29 = vpop.eup %5215  ;;  %v1956_v31 = vmul.f32 %v5214_v24, %v6205_v9 }
 0x486   :  { %v1954_v1 = vmul.f32 %v5216_v29, %v6207_v10 }
 0x488   :  { %v5218_v33 = vpop.eup %5217  ;;  %4435 = vmatprep.mubr.msk.f32.mxu1 %vm1328_vm0, %v1954_v1 }
 0x489   :  { %v5220_v61 = vpop.eup %5219  ;;  %4436 = vmatmul.mubr.msk.f32.vlgmr.msra.gmra.mrb[36].mxu1 %vm1328_vm0, %v1956_v31  ;;  %v1960_v20 = vmul.f32 %v5218_v33, %v6214_v15  ;;  %v2367_v15 = vld [vmem:[%s6845_s5 + $0x10] sm:$0xff] }
 0x48a   :  { %v1926_v35 = vpop.xlane.xlu1 %1925  ;;  %4984 = vmatpush3.bf16.msra.mxu1 %v6073_v25  ;;  %v1958_v32 = vmul.f32 %v5220_v61, %v6217_v17  ;;  %v4993_v45 = vpack.c.bf16 %v2368_v43, %v2367_v15  ;;  %v3473_v61 = vld [vmem:[%s6846_s6] ss:$0 sm:$0xff] }
 0x48b   :  { %5221 = vrcp.f32 %v1926_v35  ;;  %4986 = vmatprep.subr.bf16.mxu1 %v6079_v34  ;;  %v1923_v11 = vpop.xlane.xlu0 %1922 }
 0x48c   :  { %5223 = vrcp.f32 %v1923_v11  ;;  %4438 = vmatprep.mubr.msk.f32.mxu1 %vm1328_vm0, %v1958_v32 }
 0x48d   :  { %4439 = vmatmul.mubr.msk.f32.gmra.mrb[38].mxu1 %vm1328_vm0, %v1960_v20 }
 0x48e   :  { %v1932_v9 = vpop.xlane.xlu1 %1931  ;;  %4988 = vmatpush3.bf16.msra.mxu1 %v6079_v34 }
 0x48f   :  { %5225 = vrcp.f32 %v1932_v9  ;;  %v1929_v10 = vpop.xlane.xlu0 %1928  ;;  %v5245_v9 = vld [vmem:[%s6840_s0 + $0x8] sm:$0xff] }
 0x490   :  { %5227 = vrcp.f32 %v1929_v10 }
 0x492   :  { %v1938_v25 = vpop.xlane.xlu1 %1937 }
 0x493   :  { %5229 = vrcp.f32 %v1938_v25  ;;  %v1935_v17 = vpop.xlane.xlu0 %1934  ;;  %v5246_v25 = vld [vmem:[%s6840_s0] sm:$0xff] }
 0x494   :  { %5231 = vrcp.f32 %v1935_v17 }
 0x495   :  { %v5222_v36 = vpop.eup %5221 }
 0x496   :  { %v5224_v38 = vpop.eup %5223  ;;  %v1944_v42 = vpop.xlane.xlu1 %1943  ;;  %v1964_v44 = vmul.f32 %v5222_v36, %v6229_v50 }
 0x497   :  { %5233 = vrcp.f32 %v1944_v42  ;;  %v1941_v34 = vpop.xlane.xlu0 %1940  ;;  %v1962_v41 = vmul.f32 %v5224_v38, %v6231_v51  ;;  %v5247_v42 = vld [vmem:[%s6840_s0 + $0x18] sm:$0xff] }
 0x498   :  { %5235 = vrcp.f32 %v1941_v34 }
 0x499   :  { %v5226_v46 = vpop.eup %5225  ;;  %4449 = vmatprep.mubr.msk.f32.mxu0 %vm1328_vm0, %v1962_v41  ;;  %v5248_v41 = vld [vmem:[%s6840_s0 + $0x10] sm:$0xff] }
 0x49a   :  { %v5228_v22 = vpop.eup %5227  ;;  %4450 = vmatmul.mubr.msk.f32.vlgmr.msra.gmra.mrb[32].mxu0 %vm1328_vm0, %v1964_v44  ;;  %v1968_v23 = vmul.f32 %v5226_v46, %v6237_v21  ;;  %v2867_v46 = vld [vmem:[%s6849_s9 + $0x28] sm:$0xff] }
 0x49b   :  { %v1966_v48 = vmul.f32 %v5228_v22, %v6239_v53  ;;  %4992 = vmatpush3.bf16.msra.mxu0 %v4989_v18  ;;  %v2865_v22 = vld [vmem:[%s6849_s9 + $0x18] sm:$0xff] }
 0x49c   :  { %4994 = vmatprep.subr.bf16.mxu0 %v4993_v45 }
 0x49d   :  { %v5230_v49 = vpop.eup %5229  ;;  %4452 = vmatprep.mubr.msk.f32.mxu0 %vm1328_vm0, %v1966_v48 }
 0x49e   :  { %v5232_v51 = vpop.eup %5231  ;;  %4453 = vmatmul.mubr.msk.f32.gmra.mrb[34].mxu0 %vm1328_vm0, %v1968_v23  ;;  %v1972_v30 = vmul.f32 %v5230_v49, %v6245_v58  ;;  %v4997_v58 = vpack.c.bf16 %v2370_v54, %v2369_v40  ;;  %v2869_v23 = vld [vmem:[%s6849_s9 + $0x38] sm:$0xff]  ;;  %v2862_v49 = vld [vmem:[%s6849_s9] sm:$0xff]  ;;  %v2875_v40 = vld [vmem:[%s6849_s9 + $0x68] sm:$0xff] }
 0x49f   :  { %v1970_v50 = vmul.f32 %v5232_v51, %v6247_v39  ;;  %4996 = vmatpush3.bf16.msra.mxu0 %v4993_v45  ;;  %v2371_v39 = vld [vmem:[%s6845_s5 + $0x30] sm:$0xff]  ;;  %v2863_v45 = vld [vmem:[%s6849_s9 + $0x8] sm:$0xff]  ;;  %v2866_v51 = vld [vmem:[%s6849_s9 + $0x20] sm:$0xff] }
 0x4a0   :  { %4998 = vmatprep.subr.bf16.mxu0 %v4997_v58  ;;  %v5021_v48 = vpack.c.bf16 %v2867_v46, %v2863_v45  ;;  %v2873_v54 = vld [vmem:[%s6849_s9 + $0x58] sm:$0xff]  ;;  %v2888_v46 = vld [vmem:[%s6849_s9 + $0xd0] sm:$0xff] }
 0x4a1   :  { %v5234_v52 = vpop.eup %5233  ;;  %4463 = vmatprep.mubr.msk.f32.mxu1 %vm1328_vm0, %v1970_v50  ;;  %v5053_v50 = vpack.c.bf16 %v2869_v23, %v2865_v22  ;;  %v2892_v22 = vld [vmem:[%s6849_s9 + $0xf0] sm:$0xff]  ;;  %v2895_v23 = vld [vmem:[%s6849_s9 + $0x108] sm:$0xff] }
 0x4a2   :  { %v5236_v37 = vpop.eup %5235  ;;  %4464 = vmatmul.mubr.msk.f32.vlgmr.msra.gmra.mrb[40].mxu1 %vm1328_vm0, %v1972_v30  ;;  %v1976_v53 = vmul.f32 %v5234_v52, %v6253_v47  ;;  %v5023_v30 = vpack.c.bf16 %v2866_v51, %v2862_v49  ;;  %v2864_v52 = vld [vmem:[%s6849_s9 + $0x10] sm:$0xff]  ;;  %5022 = vmatprep.subr.bf16.mxu1 %v5021_v48  ;;  %v5067_v48 = vpack.c.bf16 %v2892_v22, %v2888_v46  ;;  %v2899_v49 = vld [vmem:[%s6849_s9 + $0x128] sm:$0xff]  ;;  %v2897_v51 = vld [vmem:[%s6849_s9 + $0x118] sm:$0xff] }
 0x4a3   :  { %v1974_v21 = vmul.f32 %v5236_v37, %v6255_v28  ;;  %v5001_v28 = vpack.c.bf16 %v2372_v59, %v2371_v39  ;;  %v2868_v37 = vld [vmem:[%s6849_s9 + $0x30] sm:$0xff]  ;;  %v3191_v46 = vld [vmem:[%s6851_s11 + $0x188] sm:$0xff] }
 0x4a4   :  { %5024 = vmatpush1.bf16.msra.mxu1 %v5023_v30  ;;  %v2901_v30 = vld [vmem:[%s6849_s9 + $0x138] sm:$0xff] }
 0x4a5   :  { %4466 = vmatprep.mubr.msk.f32.mxu1 %vm1328_vm0, %v1974_v21  ;;  %v2871_v21 = vld [vmem:[%s6849_s9 + $0x48] sm:$0xff] }
 0x4a6   :  { %4467 = vmatmul.mubr.msk.f32.gmra.mrb[42].mxu1 %vm1328_vm0, %v1976_v53  ;;  %v5055_v53 = vpack.c.bf16 %v2868_v37, %v2864_v52  ;;  %v5025_v39 = vpack.c.bf16 %v2875_v40, %v2871_v21  ;;  %v2894_v52 = vld [vmem:[%s6849_s9 + $0x100] sm:$0xff]  ;;  %v5069_v21 = vpack.c.bf16 %v2901_v30, %v2897_v51  ;;  %v2896_v40 = vld [vmem:[%s6849_s9 + $0x110] sm:$0xff] }
 0x4a7   :  { %v2898_v37 = vld [vmem:[%s6849_s9 + $0x120] sm:$0xff] }
 0x4a8   :  { %5026 = vmatprep.subr.bf16.mxu1 %v5025_v39  ;;  %v2903_v39 = vld [vmem:[%s6849_s9 + $0x148] sm:$0xff] }
 0x54c   :  { %v4423_v60 = vpop.f32.mrb[28].mxu0 }
 0x54d   :  { %v2055_v47 = vpop.f32.mrb[29].mxu0 }
 0x54e   :  { %4477 = vmatprep.mubr.msk.f32.mxu0 %vm1328_vm0, %v2055_v47  ;;  %v2874_v47 = vld [vmem:[%s6849_s9 + $0x60] sm:$0xff] }
 0x54f   :  { %4478 = vmatmul.mubr.msk.f32.vlgmr.msra.gmra.mrb[36].mxu0 %vm1328_vm0, %v4423_v60  ;;  %v2870_v60 = vld [vmem:[%s6849_s9 + $0x40] sm:$0xff] }
 0x550   :  { %v4426_v3 = vpop.f32.mrb[30].mxu0  ;;  %5000 = vmatpush3.bf16.msra.mxu0 %v4997_v58  ;;  %v2877_v58 = vld [vmem:[%s6849_s9 + $0x78] sm:$0xff]  ;;  %v5027_v62 = vpack.c.bf16 %v2874_v47, %v2870_v60 }
 0x551   :  { %v2065_v4 = vpop.f32.mrb[31].mxu0  ;;  %5002 = vmatprep.subr.bf16.mxu0 %v5001_v28  ;;  %v5057_v59 = vpack.c.bf16 %v2877_v58, %v2873_v54  ;;  %v2900_v54 = vld [vmem:[%s6849_s9 + $0x130] sm:$0xff]  ;;  %v2905_v60 = vld [vmem:[%s6849_s9 + $0x158] sm:$0xff] }
 0x552   :  { %4480 = vmatprep.mubr.msk.f32.mxu0 %vm1328_vm0, %v2065_v4  ;;  %v2883_v4 = vld [vmem:[%s6849_s9 + $0xa8] sm:$0xff]  ;;  %5028 = vmatpush1.bf16.msra.mxu1 %v5027_v62  ;;  %v5071_v58 = vpack.c.bf16 %v2900_v54, %v2896_v40  ;;  %v2902_v62 = vld [vmem:[%s6849_s9 + $0x140] sm:$0xff] }
 0x553   :  { %4481 = vmatmul.mubr.msk.f32.gmra.mrb[38].mxu0 %vm1328_vm0, %v4426_v3  ;;  %v2879_v3 = vld [vmem:[%s6849_s9 + $0x88] sm:$0xff] }
 0x554   :  { %5004 = vmatpush3.bf16.msra.mxu0 %v5001_v28  ;;  %v2872_v28 = vld [vmem:[%s6849_s9 + $0x50] sm:$0xff]  ;;  %v5029_v5 = vpack.c.bf16 %v2883_v4, %v2879_v3 }
 0x555   :  { %5006 = vmatprep.subr.bf16.mxu0 %v5005_v55 }
 0x556   :  { %5030 = vmatprep.subr.bf16.mxu1 %v5029_v5  ;;  %v2908_v5 = vld [vmem:[%s6849_s9 + $0x170] sm:$0xff] }
 0x55c   :  { %v4437_v57 = vpop.f32.mrb[36].mxu1 }
 0x55d   :  { %v2152_v7 = vpop.f32.mrb[37].mxu1 }
 0x55e   :  { %4491 = vmatprep.mubr.msk.f32.mxu0 %vm1328_vm0, %v2152_v7  ;;  %v2878_v7 = vld [vmem:[%s6849_s9 + $0x80] sm:$0xff] }
 0x55f   :  { %4492 = vmatmul.mubr.msk.f32.vlgmr.msra.gmra.mrb[36].mxu0 %vm1328_vm0, %v4437_v57  ;;  %v2885_v57 = vld [vmem:[%s6849_s9 + $0xb8] sm:$0xff] }
 0x560   :  { %v4440_v13 = vpop.f32.mrb[38].mxu1  ;;  %5008 = vmatpush3.bf16.msra.mxu0 %v5005_v55  ;;  %v5059_v55 = vpack.c.bf16 %v2876_v2, %v2872_v28  ;;  %v2909_v28 = vld [vmem:[%s6849_s9 + $0x178] sm:$0xff]  ;;  %v2906_v2 = vld [vmem:[%s6849_s9 + $0x160] sm:$0xff] }
 0x561   :  { %v2162_v14 = vpop.f32.mrb[39].mxu1  ;;  %5010 = vmatprep.subr.bf16.mxu0 %v5009_v8  ;;  %v5073_v3 = vpack.c.bf16 %v2909_v28, %v2905_v60  ;;  %v5043_v4 = vpack.c.bf16 %v2906_v2, %v2902_v62  ;;  %v3142_v62 = vld [vmem:[%s6851_s11] sm:$0xff]  ;;  %v3143_v2 = vld [vmem:[%s6851_s11 + $0x8] sm:$0xff] }
 0x562   :  { %4494 = vmatprep.mubr.msk.f32.mxu0 %vm1328_vm0, %v2162_v14  ;;  %v5031_v14 = vpack.c.bf16 %v2882_v63, %v2878_v7  ;;  %v2915_v7 = vld [vmem:[%s6849_s9 + $0x1a8] sm:$0xff] }
 0x563   :  { %4495 = vmatmul.mubr.msk.f32.gmra.mrb[38].mxu0 %vm1328_vm0, %v4440_v13  ;;  %v2884_v13 = vld [vmem:[%s6849_s9 + $0xb0] sm:$0xff] }
 0x564   :  { %5012 = vmatpush3.bf16.msra.mxu0 %v5009_v8  ;;  %v5061_v8 = vpack.c.bf16 %v2885_v57, %v2881_v6  ;;  %5032 = vmatpush1.bf16.msra.mxu1 %v5031_v14  ;;  %v2911_v57 = vld [vmem:[%s6849_s9 + $0x188] sm:$0xff]  ;;  %v2914_v14 = vld [vmem:[%s6849_s9 + $0x1a0] sm:$0xff] }
 0x565   :  { %5014 = vmatprep.subr.bf16.mxu0 %v5013_v0  ;;  %v5045_v63 = vpack.c.bf16 %v2915_v7, %v2911_v57  ;;  %v5087_v7 = vpack.c.bf16 %v3143_v2, %v3142_v62  ;;  %v3150_v62 = vld [vmem:[%s6851_s11 + $0x40] sm:$0xff]  ;;  %v3151_v2 = vld [vmem:[%s6851_s11 + $0x48] sm:$0xff] }
 0x56d   :  { %v4451_v16 = vpop.f32.mrb[32].mxu0 }
 0x56e   :  { %v2249_v18 = vpop.f32.mrb[33].mxu0 }
 0x56f   :  { %4505 = vmatprep.mubr.msk.f32.mxu0 %vm1328_vm0, %v2249_v18 }
 0x570   :  { %4506 = vmatmul.mubr.msk.f32.vlgmr.msra.gmra.mrb[36].mxu0 %vm1328_vm0, %v4451_v16 }
 0x571   :  { %5016 = vmatpush3.bf16.msra.mxu0 %v5013_v0  ;;  %v4454_v26 = vpop.f32.mrb[34].mxu0  ;;  %v5063_v0 = vpack.c.bf16 %v2884_v13, %v2880_v12  ;;  %v2917_v12 = vld [vmem:[%s6849_s9 + $0x1b8] sm:$0xff]  ;;  %v2910_v13 = vld [vmem:[%s6849_s9 + $0x180] sm:$0xff] }
 0x572   :  { %v2259_v24 = vpop.f32.mrb[35].mxu0  ;;  %5018 = vmatprep.subr.bf16.mxu0 %v5017_v19 }
 0x573   :  { %4508 = vmatprep.mubr.msk.f32.mxu0 %vm1328_vm0, %v2259_v24 }
 0x574   :  { %4509 = vmatmul.mubr.msk.f32.gmra.mrb[38].mxu0 %vm1328_vm0, %v4454_v26 }
 0x575   :  { %5020 = vmatpush3.bf16.msra.mxu0 %v5017_v19  ;;  %v4465_v29 = vpop.f32.mrb[40].mxu1 }
 0x576   :  { %v2346_v1 = vpop.f32.mrb[41].mxu1  ;;  %5054 = vmatprep.subr.bf16.mxu0 %v5053_v50  ;;  %v5037_v50 = vpack.c.bf16 %v2899_v49, %v2895_v23 }
 0x577   :  { %4519 = vmatprep.mubr.msk.f32.mxu0 %vm1328_vm0, %v2346_v1 }
 0x578   :  { %4520 = vmatmul.mubr.msk.f32.vlgmr.msra.gmra.mrb[36].mxu0 %vm1328_vm0, %v4465_v29 }
 0x579   :  { %v4468_v31 = vpop.f32.mrb[42].mxu1  ;;  %5056 = vmatpush1.bf16.msra.mxu0 %v5055_v53  ;;  %v5039_v53 = vpack.c.bf16 %v2898_v37, %v2894_v52 }
 0x57a   :  { %v2356_v33 = vpop.f32.mrb[43].mxu1  ;;  %5058 = vmatprep.subr.bf16.mxu0 %v5057_v59  ;;  %v2907_v59 = vld [vmem:[%s6849_s9 + $0x168] sm:$0xff] }
 0x57b   :  { %4522 = vmatprep.mubr.msk.f32.mxu0 %vm1328_vm0, %v2356_v33  ;;  %v5041_v47 = vpack.c.bf16 %v2907_v59, %v2903_v39  ;;  %v3474_v59 = vld [vmem:[%s6847_s7] ss:$0 sm:$0xff] }
 0x57c   :  { %4523 = vmatmul.mubr.msk.f32.gmra.mrb[38].mxu0 %vm1328_vm0, %v4468_v31 }
 0x57d   :  { %5060 = vmatpush1.bf16.msra.mxu0 %v5059_v55  ;;  %v2904_v55 = vld [vmem:[%s6849_s9 + $0x150] sm:$0xff] }
 0x57e   :  { %5062 = vmatprep.subr.bf16.mxu0 %v5061_v8  ;;  %v5075_v6 = vpack.c.bf16 %v2908_v5, %v2904_v55  ;;  %v2913_v8 = vld [vmem:[%s6849_s9 + $0x198] sm:$0xff]  ;;  %v3192_v5 = vld [vmem:[%s6851_s11 + $0x190] sm:$0xff] }
 0x57f   :  { %v3161_v55 = vld [vmem:[%s6851_s11 + $0x98] sm:$0xff] }
 0x581   :  { %5064 = vmatpush1.bf16.msra.mxu0 %v5063_v0  ;;  %v5077_v0 = vpack.c.bf16 %v2917_v12, %v2913_v8  ;;  %v3144_v8 = vld [vmem:[%s6851_s11 + $0x10] sm:$0xff] }
 0x64b   :  { %v4521_v35 = vpop.f32.mrb[36].mxu0 }
 0x64c   :  { %v2789_v32 = vadd.f32 %v4521_v35, %v3473_v61  ;;  %v2750_v11 = vpop.f32.mrb[37].mxu0 }
 0x64d   :  { %v2788_v20 = vadd.f32 %v3473_v61, %v2750_v11 }
 0x64e   :  { %v6369_v10 = vadd.f32 %v5245_v9, %v2789_v32  ;;  %v2887_v9 = vld [vmem:[%s6849_s9 + $0xc8] sm:$0xff] }
 0x64f   :  { %v6374_v17 = vadd.f32 %v5246_v25, %v2788_v20  ;;  %v4524_v36 = vpop.f32.mrb[38].mxu0  ;;  %v2891_v25 = vld [vmem:[%s6849_s9 + $0xe8] sm:$0xff] }
 0x650   :  { %v2791_v15 = vadd.f32 %v4524_v36, %v3473_v61  ;;  %2800 = vadd.xlane.f32.xlu1 %v6369_v10  ;;  %v2760_v43 = vpop.f32.mrb[39].mxu0  ;;  %v2889_v36 = vld [vmem:[%s6849_s9 + $0xd8] sm:$0xff] }
 0x651   :  { %v2790_v38 = vadd.f32 %v3473_v61, %v2760_v43  ;;  %2798 = vadd.xlane.f32.xlu0 %v6374_v17  ;;  %v2893_v43 = vld [vmem:[%s6849_s9 + $0xf8] sm:$0xff] }
 0x652   :  { %v6381_v34 = vadd.f32 %v5247_v42, %v2791_v15  ;;  %v5033_v15 = vpack.c.bf16 %v2891_v25, %v2887_v9  ;;  %v2890_v42 = vld [vmem:[%s6849_s9 + $0xe0] sm:$0xff]  ;;  %v2920_v25 = vld [vmem:[%s6849_s9 + $0x1d0] sm:$0xff] }
 0x653   :  { %v6386_v44 = vadd.f32 %v5248_v41, %v2790_v38  ;;  %v2886_v38 = vld [vmem:[%s6849_s9 + $0xc0] sm:$0xff]  ;;  %v5065_v41 = vpack.c.bf16 %v2893_v43, %v2889_v36  ;;  %v2924_v36 = vld [vmem:[%s6849_s9 + $0x1f0] sm:$0xff] }
 0x654   :  { %2804 = vadd.xlane.f32.xlu1 %v6381_v34  ;;  %v5035_v45 = vpack.c.bf16 %v2890_v42, %v2886_v38  ;;  %5034 = vmatprep.subr.bf16.mxu1 %v5033_v15  ;;  %v5273_v15 = vmov 0.0   ;;  %v5083_v43 = vpack.c.bf16 %v2924_v36, %v2920_v25  ;;  %v3158_v38 = vld [vmem:[%s6851_s11 + $0x80] sm:$0xff]  ;;  %v3159_v42 = vld [vmem:[%s6851_s11 + $0x88] sm:$0xff] }
 0x655   :  { %2802 = vadd.xlane.f32.xlu0 %v6386_v44  ;;  %5066 = vmatprep.subr.bf16.mxu0 %v5065_v41  ;;  %v3190_v41 = vld [vmem:[%s6851_s11 + $0x180] sm:$0xff]  ;;  %v3147_v36 = vld [vmem:[%s6851_s11 + $0x28] sm:$0xff] }
 0x656   :  { %5036 = vmatpush1.bf16.msra.mxu1 %v5035_v45  ;;  %5068 = vmatpush1.bf16.msra.mxu0 %v5067_v48  ;;  %v5085_v45 = vpack.c.bf16 %v3159_v42, %v3158_v38  ;;  %v5117_v22 = vpack.c.bf16 %v3191_v46, %v3190_v41  ;;  %v3146_v25 = vld [vmem:[%s6851_s11 + $0x20] sm:$0xff]  ;;  %v3164_v41 = vld [vmem:[%s6851_s11 + $0xb0] sm:$0xff] }
 0x657   :  { %5038 = vmatprep.subr.bf16.mxu1 %v5037_v50  ;;  %5070 = vmatprep.subr.bf16.mxu0 %v5069_v21  ;;  %v3178_v42 = vld [vmem:[%s6851_s11 + $0x120] sm:$0xff]  ;;  %v3196_v46 = vld [vmem:[%s6851_s11 + $0x1b0] sm:$0xff] }
 0x658   :  { %3012 = vmatprep.mubr.f32.mxu1 %v5273_v15  ;;  %3101 = vmatprep.mubr.f32.mxu0 %v5273_v15 }
 0x65a   :  { %5040 = vmatpush1.bf16.msra.mxu1 %v5039_v53  ;;  %5072 = vmatpush1.bf16.msra.mxu0 %v5071_v58 }
 0x65b   :  { %5042 = vmatprep.subr.bf16.mxu1 %v5041_v47  ;;  %5074 = vmatprep.subr.bf16.mxu0 %v5073_v3  ;;  %v6623_v47 = vld [vmem:[%s6848_s8] ss:$0 sm:$0xff] }
 0x65c   :  { %v3174_v3 = vld [vmem:[%s6851_s11 + $0x100] sm:$0xff] }
 0x65e   :  { %5044 = vmatpush1.bf16.msra.mxu1 %v5043_v4  ;;  %5076 = vmatpush1.bf16.msra.mxu0 %v5075_v6  ;;  %v3193_v6 = vld [vmem:[%s6851_s11 + $0x198] sm:$0xff] }
 0x65f   :  { %5046 = vmatprep.subr.bf16.mxu1 %v5045_v63  ;;  %5078 = vmatprep.subr.bf16.mxu0 %v5077_v0  ;;  %v3145_v0 = vld [vmem:[%s6851_s11 + $0x18] sm:$0xff] }
 0x6dd   :  { %v2801_v27 = vpop.xlane.xlu1 %2800 }
 0x6de   :  { %v2807_v56 = vmul.f32 0.0078125, %v2801_v27  ;;  %v2799_v16 = vpop.xlane.xlu0 %2798  ;;  %v5047_v27 = vpack.c.bf16 %v2914_v14, %v2910_v13 }
 0x6df   :  { %v2806_v18 = vmul.f32 0.0078125, %v2799_v16  ;;  %v2916_v16 = vld [vmem:[%s6849_s9 + $0x1b0] sm:$0xff] }
 0x6e0   :  { %v6463_v19 = vsub.f32 %v6369_v10, %v2807_v56  ;;  %v2912_v56 = vld [vmem:[%s6849_s9 + $0x190] sm:$0xff]  ;;  %5048 = vmatpush1.bf16.msra.mxu1 %v5047_v27 }
 0x6e1   :  { %v6466_v26 = vsub.f32 %v6374_v17, %v2806_v18  ;;  %v2805_v24 = vpop.xlane.xlu1 %2804  ;;  %v5079_v18 = vpack.c.bf16 %v2916_v16, %v2912_v56  ;;  %v3176_v27 = vld [vmem:[%s6851_s11 + $0x110] sm:$0xff]  ;;  %v3177_v56 = vld [vmem:[%s6851_s11 + $0x118] sm:$0xff] }
 0x6e2   :  { %v2809_v29 = vmul.f32 0.0078125, %v2805_v24  ;;  %v2803_v1 = vpop.xlane.xlu0 %2802  ;;  %v2815_v31 = vmul.f32 %v6463_v19, %v6463_v19  ;;  %v2919_v24 = vld [vmem:[%s6849_s9 + $0x1c8] sm:$0xff] }
 0x6e3   :  { %v2808_v33 = vmul.f32 0.0078125, %v2803_v1  ;;  %v2814_v61 = vmul.f32 %v6466_v26, %v6466_v26  ;;  %v2921_v1 = vld [vmem:[%s6849_s9 + $0x1d8] sm:$0xff]  ;;  %5080 = vmatpush1.bf16.msra.mxu0 %v5079_v18 }
 0x6e4   :  { %v6473_v35 = vsub.f32 %v6381_v34, %v2809_v29  ;;  %2820 = vadd.xlane.f32.xlu1 %v2815_v31  ;;  %v2923_v29 = vld [vmem:[%s6849_s9 + $0x1e8] sm:$0xff] }
 0x6e5   :  { %v6476_v32 = vsub.f32 %v6386_v44, %v2808_v33  ;;  %2818 = vadd.xlane.f32.xlu0 %v2814_v61  ;;  %v5049_v31 = vpack.c.bf16 %v2923_v29, %v2919_v24  ;;  %v2925_v33 = vld [vmem:[%s6849_s9 + $0x1f8] sm:$0xff]  ;;  %v2918_v61 = vld [vmem:[%s6849_s9 + $0x1c0] sm:$0xff]  ;;  %v5121_v24 = vpack.c.bf16 %v3193_v6, %v3192_v5  ;;  %v3163_v29 = vld [vmem:[%s6851_s11 + $0xa8] sm:$0xff]  ;;  %v5103_v6 = vpack.c.bf16 %v3151_v2, %v3150_v62 }
 0x6e6   :  { %v2817_v11 = vmul.f32 %v6473_v35, %v6473_v35  ;;  %v3201_v5 = vld [vmem:[%s6851_s11 + $0x1d8] sm:$0xff] }
 0x6e7   :  { %v2816_v20 = vmul.f32 %v6476_v32, %v6476_v32  ;;  %5050 = vmatprep.subr.bf16.mxu1 %v5049_v31  ;;  %v3195_v31 = vld [vmem:[%s6851_s11 + $0x1a8] sm:$0xff] }
 0x6e8   :  { %2824 = vadd.xlane.f32.xlu1 %v2817_v11  ;;  %v2922_v11 = vld [vmem:[%s6849_s9 + $0x1e0] sm:$0xff] }
 0x6e9   :  { %2822 = vadd.xlane.f32.xlu0 %v2816_v20  ;;  %v5081_v20 = vpack.c.bf16 %v2925_v33, %v2921_v1  ;;  %v5051_v9 = vpack.c.bf16 %v2922_v11, %v2918_v61  ;;  %v3194_v1 = vld [vmem:[%s6851_s11 + $0x1a0] sm:$0xff]  ;;  %v5091_v33 = vpack.c.bf16 %v3145_v0, %v3144_v8  ;;  %v5123_v61 = vpack.c.bf16 %v3177_v56, %v3176_v27  ;;  %v3153_v8 = vld [vmem:[%s6851_s11 + $0x58] sm:$0xff]  ;;  %v3171_v27 = vld [vmem:[%s6851_s11 + $0xe8] sm:$0xff] }
 0x6ea   :  { %v5125_v38 = vpack.c.bf16 %v3195_v31, %v3194_v1  ;;  %v3170_v0 = vld [vmem:[%s6851_s11 + $0xe0] sm:$0xff]  ;;  %v3155_v31 = vld [vmem:[%s6851_s11 + $0x68] sm:$0xff] }
 0x6eb   :  { %5082 = vmatprep.subr.bf16.mxu0 %v5081_v20  ;;  %5052 = vmatpush1.bf16.msra.mxu1 %v5051_v9  ;;  %v3202_v56 = vld [vmem:[%s6851_s11 + $0x1e0] sm:$0xff] }
 0x6ec   :  { %5084 = vmatpush1.bf16.msra.mxu0 %v5083_v43  ;;  %5086 = vmatprep.subr.bf16.mxu1 %v5085_v45  ;;  %v3165_v45 = vld [vmem:[%s6851_s11 + $0xb8] sm:$0xff]  ;;  %v3154_v1 = vld [vmem:[%s6851_s11 + $0x60] sm:$0xff] }
 0x6ed   :  { %5118 = vmatprep.subr.bf16.mxu0 %v5117_v22  ;;  %v3197_v22 = vld [vmem:[%s6851_s11 + $0x1b8] sm:$0xff] }
 0x771   :  { %v2821_v48 = vpop.xlane.xlu1 %2820 }
 0x772   :  { %v2827_v23 = vmul.f32 0.0078125, %v2821_v48  ;;  %v2819_v49 = vpop.xlane.xlu0 %2818  ;;  %v5095_v48 = vpack.c.bf16 %v3147_v36, %v3146_v25  ;;  %v3173_v25 = vld [vmem:[%s6851_s11 + $0xf8] sm:$0xff]  ;;  %v3204_v36 = vld [vmem:[%s6851_s11 + $0x1f0] sm:$0xff] }
 0x773   :  { %v2826_v51 = vmul.f32 0.0078125, %v2819_v49 }
 0x774   :  { %v2831_v50 = vadd.f32 1e-05, %v2827_v23 }
 0x775   :  { %v2830_v30 = vadd.f32 1e-05, %v2826_v51  ;;  %v2825_v52 = vpop.xlane.xlu1 %2824 }
 0x776   :  { %5237 = vrsqrt.f32 %v2831_v50  ;;  %v2829_v37 = vmul.f32 0.0078125, %v2825_v52  ;;  %v2823_v21 = vpop.xlane.xlu0 %2822  ;;  %v3148_v50 = vld [vmem:[%s6851_s11 + $0x30] sm:$0xff]  ;;  %v5097_v52 = vpack.c.bf16 %v3165_v45, %v3164_v41 }
 0x777   :  { %5239 = vrsqrt.f32 %v2830_v30  ;;  %v2828_v53 = vmul.f32 0.0078125, %v2823_v21  ;;  %v3149_v30 = vld [vmem:[%s6851_s11 + $0x38] sm:$0xff]  ;;  %v3180_v21 = vld [vmem:[%s6851_s11 + $0x130] sm:$0xff] }
 0x778   :  { %v2833_v40 = vadd.f32 1e-05, %v2829_v37  ;;  %v5129_v37 = vpack.c.bf16 %v3197_v22, %v3196_v46  ;;  %v3188_v46 = vld [vmem:[%s6851_s11 + $0x170] sm:$0xff]  ;;  %v3189_v22 = vld [vmem:[%s6851_s11 + $0x178] sm:$0xff] }
 0x779   :  { %v2832_v54 = vadd.f32 1e-05, %v2828_v53  ;;  %v3181_v53 = vld [vmem:[%s6851_s11 + $0x138] sm:$0xff] }
 0x77b   :  { %5241 = vrsqrt.f32 %v2832_v54  ;;  %v3167_v54 = vld [vmem:[%s6851_s11 + $0xc8] sm:$0xff] }
 0x77c   :  { %5243 = vrsqrt.f32 %v2833_v40  ;;  %v3166_v40 = vld [vmem:[%s6851_s11 + $0xc0] sm:$0xff] }
 0x780   :  { %v5238_v58 = vpop.eup %5237 }
 0x781   :  { %v5240_v39 = vpop.eup %5239  ;;  %v2839_v28 = vmul.f32 %v5238_v58, %v6463_v19  ;;  %v3160_v19 = vld [vmem:[%s6851_s11 + $0x90] sm:$0xff]  ;;  %v3198_v58 = vld [vmem:[%s6851_s11 + $0x1c0] sm:$0xff] }
 0x782   :  { %v2838_v60 = vmul.f32 %v5240_v39, %v6466_v26  ;;  %v3175_v26 = vld [vmem:[%s6851_s11 + $0x108] sm:$0xff]  ;;  %v5089_v18 = vpack.c.bf16 %v3161_v55, %v3160_v19  ;;  %v3168_v19 = vld [vmem:[%s6851_s11 + $0xd0] sm:$0xff] }
 0x783   :  { %v2849_v12 = vmul.f32 %v3474_v59, %v2839_v28  ;;  %v5119_v14 = vpack.c.bf16 %v3175_v26, %v3174_v3  ;;  %v3199_v39 = vld [vmem:[%s6851_s11 + $0x1c8] sm:$0xff]  ;;  %v5131_v28 = vpack.c.bf16 %v3181_v53, %v3180_v21  ;;  %v5101_v3 = vpack.c.bf16 %v3167_v54, %v3166_v40  ;;  %v3200_v55 = vld [vmem:[%s6851_s11 + $0x1d0] sm:$0xff] }
 0x784   :  { %v2848_v4 = vmul.f32 %v3474_v59, %v2838_v60  ;;  %v5099_v60 = vpack.c.bf16 %v3149_v30, %v3148_v50  ;;  %v5133_v26 = vpack.c.bf16 %v3199_v39, %v3198_v58  ;;  %v2926_v30 = vld [vmem:[%s6850_s10] sm:$0xf] }
 0x785   :  { %v5242_v57 = vpop.eup %5241  ;;  %v2859_v11 = vadd.f32 %v6623_v47, %v2849_v12  ;;  %v5137_v12 = vpack.c.bf16 %v3201_v5, %v3200_v55 }
 0x786   :  { %v2858_v63 = vadd.f32 %v6623_v47, %v2848_v4  ;;  %v2840_v13 = vmul.f32 %v5242_v57, %v6476_v32  ;;  %v5244_v16 = vpop.eup %5243  ;;  %v3162_v32 = vld [vmem:[%s6851_s11 + $0xa0] sm:$0xff]  ;;  %v3169_v4 = vld [vmem:[%s6851_s11 + $0xd8] sm:$0xff] }
 0x787   :  { %v2841_v9 = vmul.f32 %v5244_v16, %v6473_v35  ;;  %v5093_v43 = vpack.c.bf16 %v3163_v29, %v3162_v32  ;;  %v3179_v35 = vld [vmem:[%s6851_s11 + $0x128] sm:$0xff]  ;;  %v5109_v32 = vpack.c.bf16 %v3171_v27, %v3170_v0 }
 0x788   :  { %3013 = vmatmul.mubr.f32.vlgmr.msra.gmra.mrb[44].mxu1 %v2858_v63  ;;  %3102 = vmatmul.mubr.f32.vlgmr.msra.gmra.mrb[40].mxu0 %v2858_v63  ;;  %v2850_v20 = vmul.f32 %v3474_v59, %v2840_v13  ;;  %v5127_v51 = vpack.c.bf16 %v3179_v35, %v3178_v42  ;;  %v5105_v63 = vpack.c.bf16 %v3169_v4, %v3168_v19  ;;  %v3184_v13 = vld [vmem:[%s6851_s11 + $0x150] sm:$0xff]  ;;  %v3203_v16 = vld [vmem:[%s6851_s11 + $0x1e8] sm:$0xff]  ;;  %v3157_v35 = vld [vmem:[%s6851_s11 + $0x78] sm:$0xff] }
 0x789   :  { %3018 = vmatprep.mubr.f32.mxu1 %v5273_v15  ;;  %3107 = vmatprep.mubr.f32.mxu0 %v5273_v15  ;;  %v2851_v49 = vmul.f32 %v3474_v59, %v2841_v9  ;;  %v5141_v29 = vpack.c.bf16 %v3203_v16, %v3202_v56  ;;  %v3172_v9 = vld [vmem:[%s6851_s11 + $0xf0] sm:$0xff] }
 0x78a   :  { %5088 = vmatpush3.bf16.msra.mxu1 %v5087_v7  ;;  %5120 = vmatpush3.bf16.msra.mxu0 %v5119_v14  ;;  %v2860_v23 = vadd.f32 %v6623_v47, %v2850_v20  ;;  %v3152_v7 = vld [vmem:[%s6851_s11 + $0x50] sm:$0xff]  ;;  %v3185_v14 = vld [vmem:[%s6851_s11 + $0x158] sm:$0xff] }
 0x78b   :  { %5090 = vmatprep.subr.bf16.mxu1 %v5089_v18  ;;  %5122 = vmatprep.subr.bf16.mxu0 %v5121_v24  ;;  %v2861_v59 = vadd.f32 %v6623_v47, %v2851_v49  ;;  %v3183_v47 = vld [vmem:[%s6851_s11 + $0x148] sm:$0xff]  ;;  %v5107_v18 = vpack.c.bf16 %v3153_v8, %v3152_v7  ;;  %v5139_v24 = vpack.c.bf16 %v3185_v14, %v3184_v13  ;;  %v3156_v42 = vld [vmem:[%s6851_s11 + $0x70] sm:$0xff] }
 0x78c   :  { %3019 = vmatmul.mubr.f32.gmra.mrb[46].mxu1 %v2859_v11  ;;  %3108 = vmatmul.mubr.f32.gmra.mrb[42].mxu0 %v2859_v11  ;;  %v3187_v11 = vld [vmem:[%s6851_s11 + $0x168] sm:$0xff]  ;;  %v5115_v45 = vpack.c.bf16 %v3157_v35, %v3156_v42 }
 0x78d   :  { %3024 = vmatprep.mubr.f32.mxu1 %v5273_v15  ;;  %3113 = vmatprep.mubr.f32.mxu0 %v5273_v15 }
 0x78e   :  { %5092 = vmatpush3.bf16.msra.mxu1 %v5091_v33  ;;  %5124 = vmatpush3.bf16.msra.mxu0 %v5123_v61  ;;  %v3186_v33 = vld [vmem:[%s6851_s11 + $0x160] sm:$0xff]  ;;  %v5111_v61 = vpack.c.bf16 %v3155_v31, %v3154_v1 }
 0x78f   :  { %5094 = vmatprep.subr.bf16.mxu1 %v5093_v43  ;;  %5126 = vmatprep.subr.bf16.mxu0 %v5125_v38  ;;  %v5143_v20 = vpack.c.bf16 %v3187_v11, %v3186_v33  ;;  %v5113_v43 = vpack.c.bf16 %v3173_v25, %v3172_v9  ;;  %v3205_v38 = vld [vmem:[%s6851_s11 + $0x1f8] sm:$0xff] }
 0x790   :  { %3025 = vmatmul.mubr.f32.gmra.mrb[48].mxu1 %v2860_v23  ;;  %3114 = vmatmul.mubr.f32.gmra.mrb[44].mxu0 %v2860_v23  ;;  %v5145_v41 = vpack.c.bf16 %v3205_v38, %v3204_v36  ;;  %v2928_v23 = vlaneseq }
 0x791   :  { %3030 = vmatprep.mubr.f32.mxu1 %v5273_v15  ;;  %3119 = vmatprep.mubr.f32.mxu0 %v5273_v15  ;;  %v3182_v15 = vld [vmem:[%s6851_s11 + $0x140] sm:$0xff] }
 0x792   :  { %5096 = vmatpush3.bf16.msra.mxu1 %v5095_v48  ;;  %5128 = vmatpush3.bf16.msra.mxu0 %v5127_v51  ;;  %v5135_v57 = vpack.c.bf16 %v3183_v47, %v3182_v15  ;;  %v5147_v48 = vpack.c.bf16 %v3189_v22, %v3188_v46  ;;  %v2929_v49 = vshrl.u32 %v2928_v23, 7 }
 0x793   :  { %5098 = vmatprep.subr.bf16.mxu1 %v5097_v52  ;;  %5130 = vmatprep.subr.bf16.mxu0 %v5129_v37 }
 0x794   :  { %3031 = vmatmul.mubr.f32.gmra.mrb[50].mxu1 %v2861_v59  ;;  %3120 = vmatmul.mubr.f32.gmra.mrb[46].mxu0 %v2861_v59  ;;  %v2930_v51 = vsub.s32 0, %v2929_v49  ;;  %v2938_v50 = vsub.s32 2, %v2929_v49  ;;  %v2934_v52 = vsub.s32 1, %v2929_v49  ;;  %v2942_v37 = vsub.s32 3, %v2929_v49  ;;  %v3476_v49 = vld [vmem:[%s6852_s12] ss:$0 sm:$0xff] }
 0x795   :  { %s5274_s12 = smov [#allocation2]  }
 0x796   :  { %5100 = vmatpush3.bf16.msra.mxu1 %v5099_v60  ;;  %5132 = vmatpush3.bf16.msra.mxu0 %v5131_v28  ;;  %v2931_v21 = vrot.slane %v2926_v30, %v2930_v51  ;;  %v2939_v53 = vrot.slane %v2926_v30, %v2938_v50  ;;  %v2935_v40 = vrot.slane %v2926_v30, %v2934_v52  ;;  %s3396_s23 = sshll.u32 %s5274_s12, 4  ;;  %s3397_s23 = int_to_ptr.vmem [resolvable:$true] %s3396_s23 }
 0x797   :  { %5102 = vmatprep.subr.bf16.mxu1 %v5101_v3  ;;  %5134 = vmatprep.subr.bf16.mxu0 %v5133_v26  ;;  %v2943_v54 = vrot.slane %v2926_v30, %v2942_v37  ;;  %s5249_s24 = scalar_lea.vmem %s3397_s23, 512  ;;  %p5254_p1 = scmp.lt.s32.totalorder %s3397_s23, %s3397_s23 }
 0x798   :  { %p5250_p0 = scmp.ne.s32.totalorder %s3397_s23, %s5249_s24  ;;  %p5255_p2 = scmp.lt.s32.totalorder %s5249_s24, %s5249_s24 }
 0x79a   :  { %5104 = vmatpush3.bf16.msra.mxu1 %v5103_v6  ;;  %5136 = vmatpush3.bf16.msra.mxu0 %v5135_v57  ;;  %p5256_p3 = por %p5255_p2, %p5254_p1 }
 0x79b   :  { %5106 = vmatprep.subr.bf16.mxu1 %v5105_v63  ;;  %5138 = vmatprep.subr.bf16.mxu0 %v5137_v12 }
 0x79c   :  { %p5257_p4 = pnand %p5256_p3, %p5250_p0 }
 0x79e   :  { %5108 = vmatpush3.bf16.msra.mxu1 %v5107_v18  ;;  %5140 = vmatpush3.bf16.msra.mxu0 %v5139_v24 }
 0x79f   :  { %5110 = vmatprep.subr.bf16.mxu1 %v5109_v32  ;;  %5142 = vmatprep.subr.bf16.mxu0 %v5141_v29 }
 0x7a2   :  { %5112 = vmatpush3.bf16.msra.mxu1 %v5111_v61  ;;  %5144 = vmatpush3.bf16.msra.mxu0 %v5143_v20 }
 0x7a3   :  { %5114 = vmatprep.subr.bf16.mxu1 %v5113_v43  ;;  %5146 = vmatprep.subr.bf16.mxu0 %v5145_v41 }
 0x7a6   :  { %5116 = vmatpush3.bf16.msra.mxu1 %v5115_v45  ;;  %5148 = vmatpush3.bf16.msra.mxu0 %v5147_v48 }
 0x85b   :  { %v3014_v58 = vpop.f32.mrb[44].mxu1  ;;  %v3103_v39 = vpop.f32.mrb[40].mxu0 }
 0x85c   :  { %v3015_v59 = vadd.f32 %v3014_v58, %v2931_v21  ;;  %v3104_v60 = vadd.f32 %v3103_v39, %v2939_v53  ;;  %v3016_v28 = vpop.f32.mrb[45].mxu1  ;;  %v3105_v62 = vpop.f32.mrb[41].mxu0 }
 0x85d   :  { %v3017_v2 = vadd.f32 %v3016_v28, %v2935_v40  ;;  %v3106_v3 = vadd.f32 %v3105_v62, %v2943_v54 }
 0x85e   :  { %v3126_v4 = vmax.f32 %v3015_v59, 0.0  ;;  %v3128_v55 = vmax.f32 %v3104_v60, 0.0 }
 0x85f   :  { %v3127_v26 = vmax.f32 %v3017_v2, 0.0  ;;  %v3129_v15 = vmax.f32 %v3106_v3, 0.0  ;;  %v3020_v47 = vpop.f32.mrb[46].mxu1  ;;  %v3109_v19 = vpop.f32.mrb[42].mxu0 }
 0x860   :  { %v3021_v5 = vadd.f32 %v3020_v47, %v2931_v21  ;;  %v3110_v6 = vadd.f32 %v3109_v19, %v2939_v53  ;;  %v3022_v57 = vpop.f32.mrb[47].mxu1  ;;  %v3111_v7 = vpop.f32.mrb[43].mxu0 }
 0x861   :  { %v3023_v8 = vadd.f32 %v3022_v57, %v2935_v40  ;;  %v3112_v63 = vadd.f32 %v3111_v7, %v2943_v54  ;;  %3277 = vmatprep.mubr.f32.mxu1 %v3127_v26  ;;  %3362 = vmatprep.mubr.f32.mxu0 %v3129_v15 }
 0x862   :  { %3278 = vmatmul.mubr.f32.vlgmr.msra.gmra.mrb[52].mxu1 %v3126_v4  ;;  %3363 = vmatmul.mubr.f32.vlgmr.msra.gmra.mrb[48].mxu0 %v3128_v55  ;;  %v3130_v27 = vmax.f32 %v3021_v5, 0.0  ;;  %v3132_v56 = vmax.f32 %v3110_v6, 0.0 }
 0x863   :  { %v3131_v12 = vmax.f32 %v3023_v8, 0.0  ;;  %v3133_v13 = vmax.f32 %v3112_v63, 0.0  ;;  %v3026_v14 = vpop.f32.mrb[48].mxu1  ;;  %v3115_v0 = vpop.f32.mrb[44].mxu0 }
 0x864   :  { %v3027_v16 = vadd.f32 %v3026_v14, %v2931_v21  ;;  %v3116_v18 = vadd.f32 %v3115_v0, %v2939_v53  ;;  %v3028_v24 = vpop.f32.mrb[49].mxu1  ;;  %v3117_v32 = vpop.f32.mrb[45].mxu0 }
 0x865   :  { %v3029_v29 = vadd.f32 %v3028_v24, %v2935_v40  ;;  %v3118_v1 = vadd.f32 %v3117_v32, %v2943_v54  ;;  %3282 = vmatprep.mubr.f32.mxu1 %v3131_v12  ;;  %3367 = vmatprep.mubr.f32.mxu0 %v3133_v13 }
 0x866   :  { %3283 = vmatmul.mubr.f32.gmra.mrb[54].mxu1 %v3130_v27  ;;  %3368 = vmatmul.mubr.f32.gmra.mrb[50].mxu0 %v3132_v56  ;;  %v3134_v20 = vmax.f32 %v3027_v16, 0.0  ;;  %v3136_v9 = vmax.f32 %v3116_v18, 0.0 }
 0x867   :  { %v3135_v31 = vmax.f32 %v3029_v29, 0.0  ;;  %v3137_v33 = vmax.f32 %v3118_v1, 0.0  ;;  %v3032_v61 = vpop.f32.mrb[50].mxu1  ;;  %v3121_v11 = vpop.f32.mrb[46].mxu0 }
 0x868   :  { %v3033_v25 = vadd.f32 %v3032_v61, %v2931_v21  ;;  %v3122_v36 = vadd.f32 %v3121_v11, %v2939_v53  ;;  %v3034_v43 = vpop.f32.mrb[51].mxu1  ;;  %v3123_v38 = vpop.f32.mrb[47].mxu0 }
 0x869   :  { %v3035_v42 = vadd.f32 %v3034_v43, %v2935_v40  ;;  %v3124_v35 = vadd.f32 %v3123_v38, %v2943_v54  ;;  %3287 = vmatprep.mubr.f32.mxu1 %v3135_v31  ;;  %3372 = vmatprep.mubr.f32.mxu0 %v3137_v33 }
 0x86a   :  { %3288 = vmatmul.mubr.f32.gmra.mrb[56].mxu1 %v3134_v20  ;;  %3373 = vmatmul.mubr.f32.gmra.mrb[52].mxu0 %v3136_v9  ;;  %v3138_v46 = vmax.f32 %v3033_v25, 0.0  ;;  %v3140_v22 = vmax.f32 %v3122_v36, 0.0 }
 0x86b   :  { %v3139_v41 = vmax.f32 %v3035_v42, 0.0  ;;  %v3141_v45 = vmax.f32 %v3124_v35, 0.0 }
 0x86d   :  { %3292 = vmatprep.mubr.f32.mxu1 %v3139_v41  ;;  %3377 = vmatprep.mubr.f32.mxu0 %v3141_v45 }
 0x86e   :  { %3293 = vmatmul.mubr.f32.gmra.mrb[58].mxu1 %v3138_v46  ;;  %3378 = vmatmul.mubr.f32.gmra.mrb[54].mxu0 %v3140_v22 }
 0x935   :  { %v3845_v48 = vpop.f32.mrb[52].mxu1  ;;  %v3889_v23 = vpop.f32.mrb[48].mxu0 }
 0x936   :  { %v3846_v51 = vpop.f32.mrb[53].mxu1  ;;  %v3890_v50 = vpop.f32.mrb[49].mxu0 }
 0x937   :  { %v3847_v30 = vadd.f32 %v3846_v51, %v3845_v48  ;;  %v3891_v52 = vadd.f32 %v3890_v50, %v3889_v23 }
 0x939   :  { %v3280_v37 = vadd.f32 %v3847_v30, %v3476_v49  ;;  %v3848_v21 = vpop.f32.mrb[54].mxu1  ;;  %v3892_v53 = vpop.f32.mrb[50].mxu0 }
 0x93a   :  { %v3849_v40 = vpop.f32.mrb[55].mxu1  ;;  %v3893_v54 = vpop.f32.mrb[51].mxu0 }
 0x93b   :  { %v3365_v58 = vadd.f32 %v3891_v52, %v3280_v37  ;;  %v3850_v39 = vadd.f32 %v3849_v40, %v3848_v21  ;;  %v3894_v59 = vadd.f32 %v3893_v54, %v3892_v53 }
 0x93d   :  { %v3383_v60 = vadd.f32 %v3365_v58, %v6374_v17  ;;  %v3285_v28 = vadd.f32 %v3850_v39, %v3476_v49  ;;  %v3851_v62 = vpop.f32.mrb[56].mxu1  ;;  %v3895_v2 = vpop.f32.mrb[52].mxu0 }
 0x93e   :  { %v3852_v3 = vpop.f32.mrb[57].mxu1  ;;  %v3896_v26 = vpop.f32.mrb[53].mxu0 }
 0x93f   :  { %3387 = vst [vmem:[#allocation2] sm:$0xff] %v3383_v60  ;;  %v3370_v15 = vadd.f32 %v3894_v59, %v3285_v28  ;;  %v3853_v47 = vadd.f32 %v3852_v3, %v3851_v62  ;;  %v3897_v19 = vadd.f32 %v3896_v26, %v3895_v2 }
 0x941   :  { %v3384_v4 = vadd.f32 %v3370_v15, %v6369_v10  ;;  %v3290_v55 = vadd.f32 %v3853_v47, %v3476_v49  ;;  %v3854_v5 = vpop.f32.mrb[58].mxu1  ;;  %v3898_v6 = vpop.f32.mrb[54].mxu0 }
 0x942   :  { %v3855_v57 = vpop.f32.mrb[59].mxu1  ;;  %v3899_v7 = vpop.f32.mrb[55].mxu0 }
 0x943   :  { %3388 = vst [vmem:[#allocation2 + $0x8] sm:$0xff] %v3384_v4  ;;  %v3375_v8 = vadd.f32 %v3897_v19, %v3290_v55  ;;  %v3856_v63 = vadd.f32 %v3855_v57, %v3854_v5  ;;  %v3900_v17 = vadd.f32 %v3899_v7, %v3898_v6 }
 0x945   :  { %v3385_v12 = vadd.f32 %v3375_v8, %v6386_v44  ;;  %v3295_v13 = vadd.f32 %v3856_v63, %v3476_v49 }
 0x947   :  { %3389 = vst [vmem:[#allocation2 + $0x10] sm:$0xff] %v3385_v12  ;;  %v3380_v14 = vadd.f32 %v3900_v17, %v3295_v13 }
 0x949   :  { %v3386_v0 = vadd.f32 %v3380_v14, %v6381_v34 }
 0x94b   :  { %3390 = vst [vmem:[#allocation2 + $0x18] sm:$0xff] %v3386_v0 }
 0x94c   :  { %5260 = shalt.err (!%p5257_p4)
}
 0x94d   :  { %s5261_s3 = scalar_lea.hbm %s6853_s13, 512 }
 0x94e   :  { %p5262_p5 = scmp.ne.s32.totalorder %s6853_s13, %s5261_s3  ;;  %p5265_p6 = scmp.lt.u32.totalorder %s5261_s3, %s6853_s13 }
 0x950   :  { %p5267_p7 = pnand %p5265_p6, %p5262_p5 }
 0x952   :  { %5270 = shalt.err (!%p5267_p7)
}
 0x953   :  { %s5275_s28 = smov 128   ;;  %s5276_s29 = smov 8  }
 0x954   :  { %3402 = dma.vmem_to_hbm [thread:$0]  %s3397_s23, 512, %s6853_s13, [#allocation3], %s5275_s28, %s5275_s28, %s5276_s29  }
 0x955   :  { %5271 = dma.done.wait [#allocation3], 512  }
 0x956   :  { %5272 = vsyncadd [#allocation3], 4294966784 }
 0x957   :  { %3406 = vsyncpa [#allocation3], 1 }

</bundles_post_ra>
